<compile_context>
chip_gen: v7x
topology: tpu7x:2x2x1
jax: 0.10.0
libtpu: 0.0.40
codegen_flags: <defaults>
</compile_context>

<pallas_src>
import functools
import math

import jax
import jax.numpy as jnp
from jax.experimental import pallas as pl
from jax.experimental.pallas import tpu as pltpu


def _round_up(n, m):
    return ((n + m - 1) // m) * m


def _pick_batch_tile(batch):
    """Batch tile so large batches shard across a 'parallel' grid axis."""
    if batch <= 256:
        return batch
    for cand in (512, 256, 128, 64, 32, 16, 8):
        if batch % cand == 0:
            return cand
    return batch


def _sigmoid(z):
    # Numerically-stable sigmoid routed through the EUP tanh unit; avoids a
    # VALU divide on the serial per-step dependency chain.
    return 0.5 * (jnp.tanh(0.5 * z) + 1.0)


def _lstm_fused_kernel(x_ref, wx_ref, wh_ref, b_ref, out_ref, *, seq_len):
    # x_ref : (bt*T, I)   batch-tile of the input sequence, rows = (b, t)
    # wx_ref: (I, 4*Hp)   input -> gates weight (pre-transposed, gate-padded)
    # wh_ref: (Hp, 4*Hp)  state -> gates weight (pre-transposed, gate-padded)
    # b_ref : (1, 4*Hp)   gate bias (f32, gate-padded)
    # out_ref: (bt, Hp)   final "h_state" of the module (== last c'), f32
    #
    # Padding correctness: padded gate columns have zero weights and zero bias,
    # so pre=0 there -> i/f/o=0.5, g=0; with both states starting at 0 the
    # padded state lanes stay exactly 0 for all steps, and (since the padded
    # rows of wh are also 0) never contaminate the valid lanes.
    bt_t, _ = x_ref.shape
    bt = bt_t // seq_len
    hp = wh_ref.shape[0]
    g = 4 * hp

    wx = wx_ref[...]
    wh = wh_ref[...]
    bias = b_ref[...]

    # Hoisted input projection + bias: one MXU pass over all timesteps
    # (off the recurrent critical path, good M-occupancy).
    pre_x = jnp.dot(x_ref[...], wx, preferred_element_type=jnp.float32) + bias
    pre_x = pre_x.reshape(bt, seq_len, g)  # tile-aligned split of leading dim

    # a == module's "h_state" (fed back into the gates), bc == module's
    # "c_state".  Both f32 on-chip; only the MXU operands are cast below.
    a = jnp.zeros((bt, hp), jnp.float32)
    bc = jnp.zeros((bt, hp), jnp.float32)

    # seq_len is small & static -> fully unrolled; states stay in vregs.
    # TODO(synk): for production-length sequences switch this to a
    # lax.fori_loop (small unroll) with (a, bc) as carries to bound vreg
    # live ranges / instruction-memory growth.
    for t in range(seq_len):
        pre = pre_x[:, t, :] + jnp.dot(
            a.astype(wh.dtype), wh, preferred_element_type=jnp.float32)
        # Lane-aligned (multiple-of-128) gate slices: free full-vreg views.
        i_g = _sigmoid(pre[:, :hp])
        f_g = _sigmoid(pre[:, hp:2 * hp])
        g_g = jnp.tanh(pre[:, 2 * hp:3 * hp])
        o_g = _sigmoid(pre[:, 3 * hp:])
        c_new = f_g * bc + i_g * g_g
        h_new = o_g * jnp.tanh(c_new)
        # Replicate `h_state, c_state = cell(...)` unpacking of (c', h').
        a, bc = c_new, h_new

    out_ref[...] = a


def init_lstm_params(key, input_size, hidden_size):
    """PyTorch nn.Linear(input_size+hidden_size, 4*hidden_size) default init."""
    fan_in = input_size + hidden_size
    bound = 1.0 / math.sqrt(fan_in)
    kw, kb = jax.random.split(key)
    W = jax.random.uniform(kw, (4 * hidden_size, fan_in), jnp.float32, -bound, bound)
    b = jax.random.uniform(kb, (4 * hidden_size,), jnp.float32, -bound, bound)
    return W, b


def prepare_kernel_params(W, b, input_size, hidden_size, mxu_dtype=jnp.float32):
    """One-time (hoisted) weight flattening + lane padding + optional bf16 cast.

    mxu_dtype=jnp.bfloat16 halves weight VMEM/DMA bytes and doubles MXU
    throughput on v6e/v7x; gate math and accumulation stay f32 in the kernel
    (also the right choice on v5e, whose VPU/EUP have no bf16).
    """
    i_sz, h_sz = input_size, hidden_size
    hp = _round_up(h_sz, 128)
    wx = W[:, :i_sz].T.reshape(i_sz, 4, h_sz)      # (I, 4, H)
    wh = W[:, i_sz:].T.reshape(h_sz, 4, h_sz)      # (H, 4, H)
    bb = b.reshape(4, h_sz)
    # Zero-pad each gate block H -> Hp (128-aligned) and the state rows H -> Hp.
    wx = jnp.pad(wx, ((0, 0), (0, 0), (0, hp - h_sz))).reshape(i_sz, 4 * hp)
    wh = jnp.pad(wh, ((0, hp - h_sz), (0, 0), (0, hp - h_sz))).reshape(hp, 4 * hp)
    bb = jnp.pad(bb, ((0, 0), (0, hp - h_sz))).reshape(1, 4 * hp)
    return wx.astype(mxu_dtype), wh.astype(mxu_dtype), bb.astype(jnp.float32)


def lstm_forward(x, wx, wh, b2, hidden_size, output_size):
    """x: (B, seq_len, input_size) -> (B, output_size); matches LSTM.forward."""
    B, T, I = x.shape
    H = hidden_size
    Hp = wh.shape[0]
    G = 4 * Hp

    if x.dtype != wx.dtype:
        x = x.astype(wx.dtype)          # bf16 path: halves HBM->VMEM bytes

    bt = _pick_batch_tile(B)
    grid = (B // bt,)

    # Free bitcast reshape (no HBM transpose pass); rows are (batch, time).
    x_flat = x.reshape(B * T, I)

    flops = 2 * T * B * G * (I + Hp)
    transcendentals = 5 * T * B * Hp
    bytes_accessed = (x_flat.size * x_flat.dtype.itemsize
                      + wx.size * wx.dtype.itemsize
                      + wh.size * wh.dtype.itemsize
                      + b2.size * 4 + B * Hp * 4)

    # Explicit VMEM budget (double-buffered operands + in-kernel temporaries),
    # capped with headroom for v7x's 64 MiB physical VMEM.
    resident = (bt * T * I * x_flat.dtype.itemsize
                + wx.size * wx.dtype.itemsize
                + wh.size * wh.dtype.itemsize
                + b2.size * 4 + bt * Hp * 4)
    temporaries = 4 * bt * T * G + 16 * bt * Hp
    vmem_limit = int(min(max(2 * (2 * resident + temporaries), 4 << 20), 48 << 20))

    kernel = functools.partial(_lstm_fused_kernel, seq_len=T)

    out_full = pl.pallas_call(
        kernel,
        out_shape=jax.ShapeDtypeStruct((B, Hp), jnp.float32),
        grid=grid,
        in_specs=[
            pl.BlockSpec((bt * T, I), lambda i: (i, 0)),   # batch-tiled sequence
            pl.BlockSpec((I, G), lambda i: (0, 0)),        # weights stay resident
            pl.BlockSpec((Hp, G), lambda i: (0, 0)),
            pl.BlockSpec((1, G), lambda i: (0, 0)),
        ],
        out_specs=pl.BlockSpec((bt, Hp), lambda i: (i, 0)),
        compiler_params=pltpu.CompilerParams(
            dimension_semantics=("parallel",),             # 2 TCs on v7x at large B
            vmem_limit_bytes=vmem_limit),
        cost_estimate=pl.CostEstimate(
            flops=flops,
            transcendentals=transcendentals,
            bytes_accessed=bytes_accessed),
    )(x_flat, wx, wh, b2)

    # Module returns h_state[:, -output_size:]; valid state lanes are 0..H-1.
    return out_full[:, H - output_size:H]


def reference_forward(x, W, b, hidden_size, output_size):
    """Pure-JAX reference replicating the PyTorch module's exact semantics."""
    B, T, _ = x.shape
    H = hidden_size
    h = jnp.zeros((B, H), jnp.float32)
    c = jnp.zeros((B, H), jnp.float32)
    for t in range(T):
        x_t = x[:, t]
        store = jnp.concatenate([x_t, h], axis=-1) @ W.T + b
        i_g = jax.nn.sigmoid(store[:, :H])
        f_g = jax.nn.sigmoid(store[:, H:2 * H])
        g_g = jnp.tanh(store[:, 2 * H:3 * H])
        o_g = jax.nn.sigmoid(store[:, 3 * H:])
        c_p = f_g * c + i_g * g_g
        h_p = o_g * jnp.tanh(c_p)
        h, c = c_p, h_p        # module unpacks (c', h') into (h_state, c_state)
    return h[:, -output_size:]


if __name__ == "__main__":
    input_size, hidden_size, output_size = 4, 32, 3
    B, seq_len = 2, 8

    key = jax.random.PRNGKey(0)
    kx, kp = jax.random.split(key)
    W, b = init_lstm_params(kp, input_size, hidden_size)
    x = jax.random.normal(kx, (B, seq_len, input_size), jnp.float32)

    ref = reference_forward(x, W, b, hidden_size, output_size)

    # f32 path: exact parity with the (f32) PyTorch module semantics.
    wx, wh, b2 = prepare_kernel_params(W, b, input_size, hidden_size, jnp.float32)
    out = jax.block_until_ready(lstm_forward(x, wx, wh, b2, hidden_size, output_size))
    assert out.shape == (B, output_size), out.shape
    assert jnp.allclose(out, ref, atol=1e-4, rtol=1e-4), "f32 mismatch vs reference LSTM"

    # bf16-MXU path (v6e/v7x optimization; f32 accumulation/state/gating).
    wx16, wh16, b216 = prepare_kernel_params(W, b, input_size, hidden_size, jnp.bfloat16)
    out16 = jax.block_until_ready(lstm_forward(x, wx16, wh16, b216, hidden_size, output_size))
    assert out16.shape == (B, output_size), out16.shape
    assert jnp.allclose(out16, ref, atol=3e-2, rtol=3e-2), "bf16 mismatch vs reference LSTM"

    print("KERNEL_OK")
</pallas_src>

<mosaic_0001>
module attributes {stable_mosaic.version = 11 : i64} {
  func.func @_lstm_fused_kernel(%arg0: i32, %arg1: memref<16x4xf32, #tpu.memory_space<vmem>>, %arg2: memref<4x512xf32, #tpu.memory_space<vmem>>, %arg3: memref<128x512xf32, #tpu.memory_space<vmem>>, %arg4: memref<1x512xf32, #tpu.memory_space<vmem>>, %arg5: memref<2x128xf32, #tpu.memory_space<vmem>>) attributes {dimension_semantics = [#tpu.dimension_semantics<parallel>], iteration_bounds = array<i64: 1>, scalar_prefetch = 0 : i64, scratch_operands = 0 : i64, tpu.core_type = #tpu.core_type<tc>, window_params = [{transform_indices = @transform_0, window_bounds = array<i64: 16, 4>}, {pipeline_mode = #tpu.pipeline_mode<synchronous>, transform_indices = @transform_1, window_bounds = array<i64: 4, 512>}, {pipeline_mode = #tpu.pipeline_mode<synchronous>, transform_indices = @transform_2, window_bounds = array<i64: 128, 512>}, {pipeline_mode = #tpu.pipeline_mode<synchronous>, transform_indices = @transform_3, window_bounds = array<i64: 1, 512>}, {transform_indices = @transform_4, window_bounds = array<i64: 2, 128>}]} {
    %c0 = arith.constant 0 : index
    %c0_0 = arith.constant 0 : index
    %0 = vector.load %arg2[%c0, %c0_0] : memref<4x512xf32, #tpu.memory_space<vmem>>, vector<4x512xf32>
    %c0_1 = arith.constant 0 : index
    %c0_2 = arith.constant 0 : index
    %1 = vector.load %arg3[%c0_1, %c0_2] : memref<128x512xf32, #tpu.memory_space<vmem>>, vector<128x512xf32>
    %c0_3 = arith.constant 0 : index
    %c0_4 = arith.constant 0 : index
    %2 = vector.load %arg4[%c0_3, %c0_4] : memref<1x512xf32, #tpu.memory_space<vmem>>, vector<1x512xf32>
    %c0_5 = arith.constant 0 : index
    %c0_6 = arith.constant 0 : index
    %3 = vector.load %arg1[%c0_5, %c0_6] : memref<16x4xf32, #tpu.memory_space<vmem>>, vector<16x4xf32>
    %cst = arith.constant dense<0.000000e+00> : vector<16x512xf32>
    %4 = tpu.matmul %3, %0, %cst {dimension_numbers = #tpu.dot_dimension_numbers<[1], [0], [0], [1], [0, 0, 1, 1], [], []>} : vector<16x4xf32>, vector<4x512xf32>, vector<16x512xf32> -> vector<16x512xf32>
    %5 = vector.broadcast %2 : vector<1x512xf32> to vector<16x512xf32>
    %6 = arith.addf %4, %5 : vector<16x512xf32>
    %7 = vector.shape_cast %6 : vector<16x512xf32> to vector<2x8x512xf32>
    %cst_7 = arith.constant 0.000000e+00 : f32
    %8 = vector.broadcast %cst_7 : f32 to vector<2x128xf32>
    %cst_8 = arith.constant 0.000000e+00 : f32
    %9 = vector.broadcast %cst_8 : f32 to vector<2x128xf32>
    %10 = vector.extract_strided_slice %7 {offsets = [0, 0, 0], sizes = [2, 1, 512], strides = [1, 1, 1]} : vector<2x8x512xf32> to vector<2x1x512xf32>
    %11 = vector.shape_cast %10 : vector<2x1x512xf32> to vector<2x512xf32>
    %cst_9 = arith.constant dense<0.000000e+00> : vector<2x512xf32>
    %12 = tpu.matmul %8, %1, %cst_9 {dimension_numbers = #tpu.dot_dimension_numbers<[1], [0], [0], [1], [0, 0, 1, 1], [], []>} : vector<2x128xf32>, vector<128x512xf32>, vector<2x512xf32> -> vector<2x512xf32>
    %13 = arith.addf %11, %12 : vector<2x512xf32>
    %14 = vector.extract_strided_slice %13 {offsets = [0, 0], sizes = [2, 128], strides = [1, 1]} : vector<2x512xf32> to vector<2x128xf32>
    %cst_10 = arith.constant 5.000000e-01 : f32
    %15 = vector.broadcast %cst_10 : f32 to vector<2x128xf32>
    %16 = arith.mulf %15, %14 : vector<2x128xf32>
    %17 = math.tanh %16 : vector<2x128xf32>
    %cst_11 = arith.constant 1.000000e+00 : f32
    %18 = vector.broadcast %cst_11 : f32 to vector<2x128xf32>
    %19 = arith.addf %17, %18 : vector<2x128xf32>
    %cst_12 = arith.constant 5.000000e-01 : f32
    %20 = vector.broadcast %cst_12 : f32 to vector<2x128xf32>
    %21 = arith.mulf %20, %19 : vector<2x128xf32>
    %22 = vector.extract_strided_slice %13 {offsets = [0, 128], sizes = [2, 128], strides = [1, 1]} : vector<2x512xf32> to vector<2x128xf32>
    %cst_13 = arith.constant 5.000000e-01 : f32
    %23 = vector.broadcast %cst_13 : f32 to vector<2x128xf32>
    %24 = arith.mulf %23, %22 : vector<2x128xf32>
    %25 = math.tanh %24 : vector<2x128xf32>
    %cst_14 = arith.constant 1.000000e+00 : f32
    %26 = vector.broadcast %cst_14 : f32 to vector<2x128xf32>
    %27 = arith.addf %25, %26 : vector<2x128xf32>
    %cst_15 = arith.constant 5.000000e-01 : f32
    %28 = vector.broadcast %cst_15 : f32 to vector<2x128xf32>
    %29 = arith.mulf %28, %27 : vector<2x128xf32>
    %30 = vector.extract_strided_slice %13 {offsets = [0, 256], sizes = [2, 128], strides = [1, 1]} : vector<2x512xf32> to vector<2x128xf32>
    %31 = math.tanh %30 : vector<2x128xf32>
    %32 = vector.extract_strided_slice %13 {offsets = [0, 384], sizes = [2, 128], strides = [1, 1]} : vector<2x512xf32> to vector<2x128xf32>
    %cst_16 = arith.constant 5.000000e-01 : f32
    %33 = vector.broadcast %cst_16 : f32 to vector<2x128xf32>
    %34 = arith.mulf %33, %32 : vector<2x128xf32>
    %35 = math.tanh %34 : vector<2x128xf32>
    %cst_17 = arith.constant 1.000000e+00 : f32
    %36 = vector.broadcast %cst_17 : f32 to vector<2x128xf32>
    %37 = arith.addf %35, %36 : vector<2x128xf32>
    %cst_18 = arith.constant 5.000000e-01 : f32
    %38 = vector.broadcast %cst_18 : f32 to vector<2x128xf32>
    %39 = arith.mulf %38, %37 : vector<2x128xf32>
    %40 = arith.mulf %29, %9 : vector<2x128xf32>
    %41 = arith.mulf %21, %31 : vector<2x128xf32>
    %42 = arith.addf %40, %41 : vector<2x128xf32>
    %43 = math.tanh %42 : vector<2x128xf32>
    %44 = arith.mulf %39, %43 : vector<2x128xf32>
    %45 = vector.extract_strided_slice %7 {offsets = [0, 1, 0], sizes = [2, 1, 512], strides = [1, 1, 1]} : vector<2x8x512xf32> to vector<2x1x512xf32>
    %46 = vector.shape_cast %45 : vector<2x1x512xf32> to vector<2x512xf32>
    %cst_19 = arith.constant dense<0.000000e+00> : vector<2x512xf32>
    %47 = tpu.matmul %42, %1, %cst_19 {dimension_numbers = #tpu.dot_dimension_numbers<[1], [0], [0], [1], [0, 0, 1, 1], [], []>} : vector<2x128xf32>, vector<128x512xf32>, vector<2x512xf32> -> vector<2x512xf32>
    %48 = arith.addf %46, %47 : vector<2x512xf32>
    %49 = vector.extract_strided_slice %48 {offsets = [0, 0], sizes = [2, 128], strides = [1, 1]} : vector<2x512xf32> to vector<2x128xf32>
    %cst_20 = arith.constant 5.000000e-01 : f32
    %50 = vector.broadcast %cst_20 : f32 to vector<2x128xf32>
    %51 = arith.mulf %50, %49 : vector<2x128xf32>
    %52 = math.tanh %51 : vector<2x128xf32>
    %cst_21 = arith.constant 1.000000e+00 : f32
    %53 = vector.broadcast %cst_21 : f32 to vector<2x128xf32>
    %54 = arith.addf %52, %53 : vector<2x128xf32>
    %cst_22 = arith.constant 5.000000e-01 : f32
    %55 = vector.broadcast %cst_22 : f32 to vector<2x128xf32>
    %56 = arith.mulf %55, %54 : vector<2x128xf32>
    %57 = vector.extract_strided_slice %48 {offsets = [0, 128], sizes = [2, 128], strides = [1, 1]} : vector<2x512xf32> to vector<2x128xf32>
    %cst_23 = arith.constant 5.000000e-01 : f32
    %58 = vector.broadcast %cst_23 : f32 to vector<2x128xf32>
    %59 = arith.mulf %58, %57 : vector<2x128xf32>
    %60 = math.tanh %59 : vector<2x128xf32>
    %cst_24 = arith.constant 1.000000e+00 : f32
    %61 = vector.broadcast %cst_24 : f32 to vector<2x128xf32>
    %62 = arith.addf %60, %61 : vector<2x128xf32>
    %cst_25 = arith.constant 5.000000e-01 : f32
    %63 = vector.broadcast %cst_25 : f32 to vector<2x128xf32>
    %64 = arith.mulf %63, %62 : vector<2x128xf32>
    %65 = vector.extract_strided_slice %48 {offsets = [0, 256], sizes = [2, 128], strides = [1, 1]} : vector<2x512xf32> to vector<2x128xf32>
    %66 = math.tanh %65 : vector<2x128xf32>
    %67 = vector.extract_strided_slice %48 {offsets = [0, 384], sizes = [2, 128], strides = [1, 1]} : vector<2x512xf32> to vector<2x128xf32>
    %cst_26 = arith.constant 5.000000e-01 : f32
    %68 = vector.broadcast %cst_26 : f32 to vector<2x128xf32>
    %69 = arith.mulf %68, %67 : vector<2x128xf32>
    %70 = math.tanh %69 : vector<2x128xf32>
    %cst_27 = arith.constant 1.000000e+00 : f32
    %71 = vector.broadcast %cst_27 : f32 to vector<2x128xf32>
    %72 = arith.addf %70, %71 : vector<2x128xf32>
    %cst_28 = arith.constant 5.000000e-01 : f32
    %73 = vector.broadcast %cst_28 : f32 to vector<2x128xf32>
    %74 = arith.mulf %73, %72 : vector<2x128xf32>
    %75 = arith.mulf %64, %44 : vector<2x128xf32>
    %76 = arith.mulf %56, %66 : vector<2x128xf32>
    %77 = arith.addf %75, %76 : vector<2x128xf32>
    %78 = math.tanh %77 : vector<2x128xf32>
    %79 = arith.mulf %74, %78 : vector<2x128xf32>
    %80 = vector.extract_strided_slice %7 {offsets = [0, 2, 0], sizes = [2, 1, 512], strides = [1, 1, 1]} : vector<2x8x512xf32> to vector<2x1x512xf32>
    %81 = vector.shape_cast %80 : vector<2x1x512xf32> to vector<2x512xf32>
    %cst_29 = arith.constant dense<0.000000e+00> : vector<2x512xf32>
    %82 = tpu.matmul %77, %1, %cst_29 {dimension_numbers = #tpu.dot_dimension_numbers<[1], [0], [0], [1], [0, 0, 1, 1], [], []>} : vector<2x128xf32>, vector<128x512xf32>, vector<2x512xf32> -> vector<2x512xf32>
    %83 = arith.addf %81, %82 : vector<2x512xf32>
    %84 = vector.extract_strided_slice %83 {offsets = [0, 0], sizes = [2, 128], strides = [1, 1]} : vector<2x512xf32> to vector<2x128xf32>
    %cst_30 = arith.constant 5.000000e-01 : f32
    %85 = vector.broadcast %cst_30 : f32 to vector<2x128xf32>
    %86 = arith.mulf %85, %84 : vector<2x128xf32>
    %87 = math.tanh %86 : vector<2x128xf32>
    %cst_31 = arith.constant 1.000000e+00 : f32
    %88 = vector.broadcast %cst_31 : f32 to vector<2x128xf32>
    %89 = arith.addf %87, %88 : vector<2x128xf32>
    %cst_32 = arith.constant 5.000000e-01 : f32
    %90 = vector.broadcast %cst_32 : f32 to vector<2x128xf32>
    %91 = arith.mulf %90, %89 : vector<2x128xf32>
    %92 = vector.extract_strided_slice %83 {offsets = [0, 128], sizes = [2, 128], strides = [1, 1]} : vector<2x512xf32> to vector<2x128xf32>
    %cst_33 = arith.constant 5.000000e-01 : f32
    %93 = vector.broadcast %cst_33 : f32 to vector<2x128xf32>
    %94 = arith.mulf %93, %92 : vector<2x128xf32>
    %95 = math.tanh %94 : vector<2x128xf32>
    %cst_34 = arith.constant 1.000000e+00 : f32
    %96 = vector.broadcast %cst_34 : f32 to vector<2x128xf32>
    %97 = arith.addf %95, %96 : vector<2x128xf32>
    %cst_35 = arith.constant 5.000000e-01 : f32
    %98 = vector.broadcast %cst_35 : f32 to vector<2x128xf32>
    %99 = arith.mulf %98, %97 : vector<2x128xf32>
    %100 = vector.extract_strided_slice %83 {offsets = [0, 256], sizes = [2, 128], strides = [1, 1]} : vector<2x512xf32> to vector<2x128xf32>
    %101 = math.tanh %100 : vector<2x128xf32>
    %102 = vector.extract_strided_slice %83 {offsets = [0, 384], sizes = [2, 128], strides = [1, 1]} : vector<2x512xf32> to vector<2x128xf32>
    %cst_36 = arith.constant 5.000000e-01 : f32
    %103 = vector.broadcast %cst_36 : f32 to vector<2x128xf32>
    %104 = arith.mulf %103, %102 : vector<2x128xf32>
    %105 = math.tanh %104 : vector<2x128xf32>
    %cst_37 = arith.constant 1.000000e+00 : f32
    %106 = vector.broadcast %cst_37 : f32 to vector<2x128xf32>
    %107 = arith.addf %105, %106 : vector<2x128xf32>
    %cst_38 = arith.constant 5.000000e-01 : f32
    %108 = vector.broadcast %cst_38 : f32 to vector<2x128xf32>
    %109 = arith.mulf %108, %107 : vector<2x128xf32>
    %110 = arith.mulf %99, %79 : vector<2x128xf32>
    %111 = arith.mulf %91, %101 : vector<2x128xf32>
    %112 = arith.addf %110, %111 : vector<2x128xf32>
    %113 = math.tanh %112 : vector<2x128xf32>
    %114 = arith.mulf %109, %113 : vector<2x128xf32>
    %115 = vector.extract_strided_slice %7 {offsets = [0, 3, 0], sizes = [2, 1, 512], strides = [1, 1, 1]} : vector<2x8x512xf32> to vector<2x1x512xf32>
    %116 = vector.shape_cast %115 : vector<2x1x512xf32> to vector<2x512xf32>
    %cst_39 = arith.constant dense<0.000000e+00> : vector<2x512xf32>
    %117 = tpu.matmul %112, %1, %cst_39 {dimension_numbers = #tpu.dot_dimension_numbers<[1], [0], [0], [1], [0, 0, 1, 1], [], []>} : vector<2x128xf32>, vector<128x512xf32>, vector<2x512xf32> -> vector<2x512xf32>
    %118 = arith.addf %116, %117 : vector<2x512xf32>
    %119 = vector.extract_strided_slice %118 {offsets = [0, 0], sizes = [2, 128], strides = [1, 1]} : vector<2x512xf32> to vector<2x128xf32>
    %cst_40 = arith.constant 5.000000e-01 : f32
    %120 = vector.broadcast %cst_40 : f32 to vector<2x128xf32>
    %121 = arith.mulf %120, %119 : vector<2x128xf32>
    %122 = math.tanh %121 : vector<2x128xf32>
    %cst_41 = arith.constant 1.000000e+00 : f32
    %123 = vector.broadcast %cst_41 : f32 to vector<2x128xf32>
    %124 = arith.addf %122, %123 : vector<2x128xf32>
    %cst_42 = arith.constant 5.000000e-01 : f32
    %125 = vector.broadcast %cst_42 : f32 to vector<2x128xf32>
    %126 = arith.mulf %125, %124 : vector<2x128xf32>
    %127 = vector.extract_strided_slice %118 {offsets = [0, 128], sizes = [2, 128], strides = [1, 1]} : vector<2x512xf32> to vector<2x128xf32>
    %cst_43 = arith.constant 5.000000e-01 : f32
    %128 = vector.broadcast %cst_43 : f32 to vector<2x128xf32>
    %129 = arith.mulf %128, %127 : vector<2x128xf32>
    %130 = math.tanh %129 : vector<2x128xf32>
    %cst_44 = arith.constant 1.000000e+00 : f32
    %131 = vector.broadcast %cst_44 : f32 to vector<2x128xf32>
    %132 = arith.addf %130, %131 : vector<2x128xf32>
    %cst_45 = arith.constant 5.000000e-01 : f32
    %133 = vector.broadcast %cst_45 : f32 to vector<2x128xf32>
    %134 = arith.mulf %133, %132 : vector<2x128xf32>
    %135 = vector.extract_strided_slice %118 {offsets = [0, 256], sizes = [2, 128], strides = [1, 1]} : vector<2x512xf32> to vector<2x128xf32>
    %136 = math.tanh %135 : vector<2x128xf32>
    %137 = vector.extract_strided_slice %118 {offsets = [0, 384], sizes = [2, 128], strides = [1, 1]} : vector<2x512xf32> to vector<2x128xf32>
    %cst_46 = arith.constant 5.000000e-01 : f32
    %138 = vector.broadcast %cst_46 : f32 to vector<2x128xf32>
    %139 = arith.mulf %138, %137 : vector<2x128xf32>
    %140 = math.tanh %139 : vector<2x128xf32>
    %cst_47 = arith.constant 1.000000e+00 : f32
    %141 = vector.broadcast %cst_47 : f32 to vector<2x128xf32>
    %142 = arith.addf %140, %141 : vector<2x128xf32>
    %cst_48 = arith.constant 5.000000e-01 : f32
    %143 = vector.broadcast %cst_48 : f32 to vector<2x128xf32>
    %144 = arith.mulf %143, %142 : vector<2x128xf32>
    %145 = arith.mulf %134, %114 : vector<2x128xf32>
    %146 = arith.mulf %126, %136 : vector<2x128xf32>
    %147 = arith.addf %145, %146 : vector<2x128xf32>
    %148 = math.tanh %147 : vector<2x128xf32>
    %149 = arith.mulf %144, %148 : vector<2x128xf32>
    %150 = vector.extract_strided_slice %7 {offsets = [0, 4, 0], sizes = [2, 1, 512], strides = [1, 1, 1]} : vector<2x8x512xf32> to vector<2x1x512xf32>
    %151 = vector.shape_cast %150 : vector<2x1x512xf32> to vector<2x512xf32>
    %cst_49 = arith.constant dense<0.000000e+00> : vector<2x512xf32>
    %152 = tpu.matmul %147, %1, %cst_49 {dimension_numbers = #tpu.dot_dimension_numbers<[1], [0], [0], [1], [0, 0, 1, 1], [], []>} : vector<2x128xf32>, vector<128x512xf32>, vector<2x512xf32> -> vector<2x512xf32>
    %153 = arith.addf %151, %152 : vector<2x512xf32>
    %154 = vector.extract_strided_slice %153 {offsets = [0, 0], sizes = [2, 128], strides = [1, 1]} : vector<2x512xf32> to vector<2x128xf32>
    %cst_50 = arith.constant 5.000000e-01 : f32
    %155 = vector.broadcast %cst_50 : f32 to vector<2x128xf32>
    %156 = arith.mulf %155, %154 : vector<2x128xf32>
    %157 = math.tanh %156 : vector<2x128xf32>
    %cst_51 = arith.constant 1.000000e+00 : f32
    %158 = vector.broadcast %cst_51 : f32 to vector<2x128xf32>
    %159 = arith.addf %157, %158 : vector<2x128xf32>
    %cst_52 = arith.constant 5.000000e-01 : f32
    %160 = vector.broadcast %cst_52 : f32 to vector<2x128xf32>
    %161 = arith.mulf %160, %159 : vector<2x128xf32>
    %162 = vector.extract_strided_slice %153 {offsets = [0, 128], sizes = [2, 128], strides = [1, 1]} : vector<2x512xf32> to vector<2x128xf32>
    %cst_53 = arith.constant 5.000000e-01 : f32
    %163 = vector.broadcast %cst_53 : f32 to vector<2x128xf32>
    %164 = arith.mulf %163, %162 : vector<2x128xf32>
    %165 = math.tanh %164 : vector<2x128xf32>
    %cst_54 = arith.constant 1.000000e+00 : f32
    %166 = vector.broadcast %cst_54 : f32 to vector<2x128xf32>
    %167 = arith.addf %165, %166 : vector<2x128xf32>
    %cst_55 = arith.constant 5.000000e-01 : f32
    %168 = vector.broadcast %cst_55 : f32 to vector<2x128xf32>
    %169 = arith.mulf %168, %167 : vector<2x128xf32>
    %170 = vector.extract_strided_slice %153 {offsets = [0, 256], sizes = [2, 128], strides = [1, 1]} : vector<2x512xf32> to vector<2x128xf32>
    %171 = math.tanh %170 : vector<2x128xf32>
    %172 = vector.extract_strided_slice %153 {offsets = [0, 384], sizes = [2, 128], strides = [1, 1]} : vector<2x512xf32> to vector<2x128xf32>
    %cst_56 = arith.constant 5.000000e-01 : f32
    %173 = vector.broadcast %cst_56 : f32 to vector<2x128xf32>
    %174 = arith.mulf %173, %172 : vector<2x128xf32>
    %175 = math.tanh %174 : vector<2x128xf32>
    %cst_57 = arith.constant 1.000000e+00 : f32
    %176 = vector.broadcast %cst_57 : f32 to vector<2x128xf32>
    %177 = arith.addf %175, %176 : vector<2x128xf32>
    %cst_58 = arith.constant 5.000000e-01 : f32
    %178 = vector.broadcast %cst_58 : f32 to vector<2x128xf32>
    %179 = arith.mulf %178, %177 : vector<2x128xf32>
    %180 = arith.mulf %169, %149 : vector<2x128xf32>
    %181 = arith.mulf %161, %171 : vector<2x128xf32>
    %182 = arith.addf %180, %181 : vector<2x128xf32>
    %183 = math.tanh %182 : vector<2x128xf32>
    %184 = arith.mulf %179, %183 : vector<2x128xf32>
    %185 = vector.extract_strided_slice %7 {offsets = [0, 5, 0], sizes = [2, 1, 512], strides = [1, 1, 1]} : vector<2x8x512xf32> to vector<2x1x512xf32>
    %186 = vector.shape_cast %185 : vector<2x1x512xf32> to vector<2x512xf32>
    %cst_59 = arith.constant dense<0.000000e+00> : vector<2x512xf32>
    %187 = tpu.matmul %182, %1, %cst_59 {dimension_numbers = #tpu.dot_dimension_numbers<[1], [0], [0], [1], [0, 0, 1, 1], [], []>} : vector<2x128xf32>, vector<128x512xf32>, vector<2x512xf32> -> vector<2x512xf32>
    %188 = arith.addf %186, %187 : vector<2x512xf32>
    %189 = vector.extract_strided_slice %188 {offsets = [0, 0], sizes = [2, 128], strides = [1, 1]} : vector<2x512xf32> to vector<2x128xf32>
    %cst_60 = arith.constant 5.000000e-01 : f32
    %190 = vector.broadcast %cst_60 : f32 to vector<2x128xf32>
    %191 = arith.mulf %190, %189 : vector<2x128xf32>
    %192 = math.tanh %191 : vector<2x128xf32>
    %cst_61 = arith.constant 1.000000e+00 : f32
    %193 = vector.broadcast %cst_61 : f32 to vector<2x128xf32>
    %194 = arith.addf %192, %193 : vector<2x128xf32>
    %cst_62 = arith.constant 5.000000e-01 : f32
    %195 = vector.broadcast %cst_62 : f32 to vector<2x128xf32>
    %196 = arith.mulf %195, %194 : vector<2x128xf32>
    %197 = vector.extract_strided_slice %188 {offsets = [0, 128], sizes = [2, 128], strides = [1, 1]} : vector<2x512xf32> to vector<2x128xf32>
    %cst_63 = arith.constant 5.000000e-01 : f32
    %198 = vector.broadcast %cst_63 : f32 to vector<2x128xf32>
    %199 = arith.mulf %198, %197 : vector<2x128xf32>
    %200 = math.tanh %199 : vector<2x128xf32>
    %cst_64 = arith.constant 1.000000e+00 : f32
    %201 = vector.broadcast %cst_64 : f32 to vector<2x128xf32>
    %202 = arith.addf %200, %201 : vector<2x128xf32>
    %cst_65 = arith.constant 5.000000e-01 : f32
    %203 = vector.broadcast %cst_65 : f32 to vector<2x128xf32>
    %204 = arith.mulf %203, %202 : vector<2x128xf32>
    %205 = vector.extract_strided_slice %188 {offsets = [0, 256], sizes = [2, 128], strides = [1, 1]} : vector<2x512xf32> to vector<2x128xf32>
    %206 = math.tanh %205 : vector<2x128xf32>
    %207 = vector.extract_strided_slice %188 {offsets = [0, 384], sizes = [2, 128], strides = [1, 1]} : vector<2x512xf32> to vector<2x128xf32>
    %cst_66 = arith.constant 5.000000e-01 : f32
    %208 = vector.broadcast %cst_66 : f32 to vector<2x128xf32>
    %209 = arith.mulf %208, %207 : vector<2x128xf32>
    %210 = math.tanh %209 : vector<2x128xf32>
    %cst_67 = arith.constant 1.000000e+00 : f32
    %211 = vector.broadcast %cst_67 : f32 to vector<2x128xf32>
    %212 = arith.addf %210, %211 : vector<2x128xf32>
    %cst_68 = arith.constant 5.000000e-01 : f32
    %213 = vector.broadcast %cst_68 : f32 to vector<2x128xf32>
    %214 = arith.mulf %213, %212 : vector<2x128xf32>
    %215 = arith.mulf %204, %184 : vector<2x128xf32>
    %216 = arith.mulf %196, %206 : vector<2x128xf32>
    %217 = arith.addf %215, %216 : vector<2x128xf32>
    %218 = math.tanh %217 : vector<2x128xf32>
    %219 = arith.mulf %214, %218 : vector<2x128xf32>
    %220 = vector.extract_strided_slice %7 {offsets = [0, 6, 0], sizes = [2, 1, 512], strides = [1, 1, 1]} : vector<2x8x512xf32> to vector<2x1x512xf32>
    %221 = vector.shape_cast %220 : vector<2x1x512xf32> to vector<2x512xf32>
    %cst_69 = arith.constant dense<0.000000e+00> : vector<2x512xf32>
    %222 = tpu.matmul %217, %1, %cst_69 {dimension_numbers = #tpu.dot_dimension_numbers<[1], [0], [0], [1], [0, 0, 1, 1], [], []>} : vector<2x128xf32>, vector<128x512xf32>, vector<2x512xf32> -> vector<2x512xf32>
    %223 = arith.addf %221, %222 : vector<2x512xf32>
    %224 = vector.extract_strided_slice %223 {offsets = [0, 0], sizes = [2, 128], strides = [1, 1]} : vector<2x512xf32> to vector<2x128xf32>
    %cst_70 = arith.constant 5.000000e-01 : f32
    %225 = vector.broadcast %cst_70 : f32 to vector<2x128xf32>
    %226 = arith.mulf %225, %224 : vector<2x128xf32>
    %227 = math.tanh %226 : vector<2x128xf32>
    %cst_71 = arith.constant 1.000000e+00 : f32
    %228 = vector.broadcast %cst_71 : f32 to vector<2x128xf32>
    %229 = arith.addf %227, %228 : vector<2x128xf32>
    %cst_72 = arith.constant 5.000000e-01 : f32
    %230 = vector.broadcast %cst_72 : f32 to vector<2x128xf32>
    %231 = arith.mulf %230, %229 : vector<2x128xf32>
    %232 = vector.extract_strided_slice %223 {offsets = [0, 128], sizes = [2, 128], strides = [1, 1]} : vector<2x512xf32> to vector<2x128xf32>
    %cst_73 = arith.constant 5.000000e-01 : f32
    %233 = vector.broadcast %cst_73 : f32 to vector<2x128xf32>
    %234 = arith.mulf %233, %232 : vector<2x128xf32>
    %235 = math.tanh %234 : vector<2x128xf32>
    %cst_74 = arith.constant 1.000000e+00 : f32
    %236 = vector.broadcast %cst_74 : f32 to vector<2x128xf32>
    %237 = arith.addf %235, %236 : vector<2x128xf32>
    %cst_75 = arith.constant 5.000000e-01 : f32
    %238 = vector.broadcast %cst_75 : f32 to vector<2x128xf32>
    %239 = arith.mulf %238, %237 : vector<2x128xf32>
    %240 = vector.extract_strided_slice %223 {offsets = [0, 256], sizes = [2, 128], strides = [1, 1]} : vector<2x512xf32> to vector<2x128xf32>
    %241 = math.tanh %240 : vector<2x128xf32>
    %242 = vector.extract_strided_slice %223 {offsets = [0, 384], sizes = [2, 128], strides = [1, 1]} : vector<2x512xf32> to vector<2x128xf32>
    %cst_76 = arith.constant 5.000000e-01 : f32
    %243 = vector.broadcast %cst_76 : f32 to vector<2x128xf32>
    %244 = arith.mulf %243, %242 : vector<2x128xf32>
    %245 = math.tanh %244 : vector<2x128xf32>
    %cst_77 = arith.constant 1.000000e+00 : f32
    %246 = vector.broadcast %cst_77 : f32 to vector<2x128xf32>
    %247 = arith.addf %245, %246 : vector<2x128xf32>
    %cst_78 = arith.constant 5.000000e-01 : f32
    %248 = vector.broadcast %cst_78 : f32 to vector<2x128xf32>
    %249 = arith.mulf %248, %247 : vector<2x128xf32>
    %250 = arith.mulf %239, %219 : vector<2x128xf32>
    %251 = arith.mulf %231, %241 : vector<2x128xf32>
    %252 = arith.addf %250, %251 : vector<2x128xf32>
    %253 = math.tanh %252 : vector<2x128xf32>
    %254 = arith.mulf %249, %253 : vector<2x128xf32>
    %255 = vector.extract_strided_slice %7 {offsets = [0, 7, 0], sizes = [2, 1, 512], strides = [1, 1, 1]} : vector<2x8x512xf32> to vector<2x1x512xf32>
    %256 = vector.shape_cast %255 : vector<2x1x512xf32> to vector<2x512xf32>
    %cst_79 = arith.constant dense<0.000000e+00> : vector<2x512xf32>
    %257 = tpu.matmul %252, %1, %cst_79 {dimension_numbers = #tpu.dot_dimension_numbers<[1], [0], [0], [1], [0, 0, 1, 1], [], []>} : vector<2x128xf32>, vector<128x512xf32>, vector<2x512xf32> -> vector<2x512xf32>
    %258 = arith.addf %256, %257 : vector<2x512xf32>
    %259 = vector.extract_strided_slice %258 {offsets = [0, 0], sizes = [2, 128], strides = [1, 1]} : vector<2x512xf32> to vector<2x128xf32>
    %cst_80 = arith.constant 5.000000e-01 : f32
    %260 = vector.broadcast %cst_80 : f32 to vector<2x128xf32>
    %261 = arith.mulf %260, %259 : vector<2x128xf32>
    %262 = math.tanh %261 : vector<2x128xf32>
    %cst_81 = arith.constant 1.000000e+00 : f32
    %263 = vector.broadcast %cst_81 : f32 to vector<2x128xf32>
    %264 = arith.addf %262, %263 : vector<2x128xf32>
    %cst_82 = arith.constant 5.000000e-01 : f32
    %265 = vector.broadcast %cst_82 : f32 to vector<2x128xf32>
    %266 = arith.mulf %265, %264 : vector<2x128xf32>
    %267 = vector.extract_strided_slice %258 {offsets = [0, 128], sizes = [2, 128], strides = [1, 1]} : vector<2x512xf32> to vector<2x128xf32>
    %cst_83 = arith.constant 5.000000e-01 : f32
    %268 = vector.broadcast %cst_83 : f32 to vector<2x128xf32>
    %269 = arith.mulf %268, %267 : vector<2x128xf32>
    %270 = math.tanh %269 : vector<2x128xf32>
    %cst_84 = arith.constant 1.000000e+00 : f32
    %271 = vector.broadcast %cst_84 : f32 to vector<2x128xf32>
    %272 = arith.addf %270, %271 : vector<2x128xf32>
    %cst_85 = arith.constant 5.000000e-01 : f32
    %273 = vector.broadcast %cst_85 : f32 to vector<2x128xf32>
    %274 = arith.mulf %273, %272 : vector<2x128xf32>
    %275 = vector.extract_strided_slice %258 {offsets = [0, 256], sizes = [2, 128], strides = [1, 1]} : vector<2x512xf32> to vector<2x128xf32>
    %276 = math.tanh %275 : vector<2x128xf32>
    %277 = arith.mulf %274, %254 : vector<2x128xf32>
    %278 = arith.mulf %266, %276 : vector<2x128xf32>
    %279 = arith.addf %277, %278 : vector<2x128xf32>
    %c0_86 = arith.constant 0 : index
    %c0_87 = arith.constant 0 : index
    %280 = vector.load %arg5[%c0_86, %c0_87] : memref<2x128xf32, #tpu.memory_space<vmem>>, vector<2x128xf32>
    tpu.vector_store %arg5[%c0_86, %c0_87], %279 {strides = array<i32>} : memref<2x128xf32, #tpu.memory_space<vmem>>, vector<2x128xf32>,
    return
  }
  func.func @transform_0(%arg0: i32) -> (i32, i32) {
    %c0_i32 = arith.constant 0 : i32
    %c0_i32_0 = arith.constant 0 : i32
    return %arg0, %c0_i32 : i32, i32
  }
  func.func @transform_1(%arg0: i32) -> (i32, i32) {
    %c0_i32 = arith.constant 0 : i32
    %c0_i32_0 = arith.constant 0 : i32
    %c0_i32_1 = arith.constant 0 : i32
    return %c0_i32, %c0_i32_0 : i32, i32
  }
  func.func @transform_2(%arg0: i32) -> (i32, i32) {
    %c0_i32 = arith.constant 0 : i32
    %c0_i32_0 = arith.constant 0 : i32
    %c0_i32_1 = arith.constant 0 : i32
    return %c0_i32, %c0_i32_0 : i32, i32
  }
  func.func @transform_3(%arg0: i32) -> (i32, i32) {
    %c0_i32 = arith.constant 0 : i32
    %c0_i32_0 = arith.constant 0 : i32
    %c0_i32_1 = arith.constant 0 : i32
    return %c0_i32, %c0_i32_0 : i32, i32
  }
  func.func @transform_4(%arg0: i32) -> (i32, i32) {
    %c0_i32 = arith.constant 0 : i32
    %c0_i32_0 = arith.constant 0 : i32
    return %arg0, %c0_i32 : i32, i32
  }
}

</mosaic_0001>

<bundles_post_ra>
// kernel: tpu_custom_call.1
= control target key start
LH: loop header
LB: loop body
LE: loop exit
PB: predicated region body
PF: predicated region fallthrough
CT: control target
= control target key end

     0   :  { %9 = vsyncpa [#allocation3], 0  ;;  %s3288_s0 = inlined_call_operand.vmem [shape: f32[16,4], index: 0, kind: input, shape index: {}]   ;;  %s3289_s1 = inlined_call_operand.vmem [shape: f32[4,512], index: 1, kind: input, shape index: {}]   ;;  %s3290_s2 = inlined_call_operand.hbm [shape: f32[128,512], index: 2, kind: input, shape index: {}]   ;;  %s3291_s3 = inlined_call_operand.vmem [shape: f32[1,512], index: 3, kind: input, shape index: {}]   ;;  %s3292_s4 = inlined_call_operand.hbm [shape: f32[2,128], index: 4, kind: output, shape index: {}]  }
   0x1   :  { %10 = vsyncpa [#allocation4], 0  ;;  %s2748_s15 = smov [#allocation2]   ;;  %s2700_s19 = scalar_lea.hbm %s3290_s2, 8192 }
   0x2   :  { %s20_s16 = sshll.u32 %s2748_s15, 4  ;;  %p2701_p0 = scmp.ne.s32.totalorder %s3290_s2, %s2700_s19  ;;  %s21_s16 = int_to_ptr.vmem [resolvable:$true] %s20_s16 }
   0x3   :  { %p2704_p1 = scmp.lt.u32.totalorder %s2700_s19, %s3290_s2 }
   0x5   :  { %p2706_p2 = pnand %p2704_p1, %p2701_p0 }
   0x7   :  { %2709 = shalt.err (!%p2706_p2)
}
   0x8   :  { %s2710_s24 = scalar_lea.vmem %s21_s16, 8192  ;;  %p2715_p4 = scmp.lt.s32.totalorder %s21_s16, %s21_s16 }
   0x9   :  { %p2711_p3 = scmp.ne.s32.totalorder %s21_s16, %s2710_s24  ;;  %p2716_p5 = scmp.lt.s32.totalorder %s2710_s24, %s2710_s24 }
   0xb   :  { %p2717_p6 = por %p2716_p5, %p2715_p4 }
   0xd   :  { %p2718_p7 = pnand %p2717_p6, %p2711_p3 }
   0xf   :  { %2721 = shalt.err (!%p2718_p7)
}
  0x10   :  { %s2749_s25 = smov 512   ;;  %s2750_s26 = smov 32  }
  0x11   :  { %26 = dma.hbm_to_vmem [thread:$0]  %s3290_s2, 8192, %s21_s16, [#allocation3], %s2749_s25, %s2749_s25, %s2750_s26  }
  0x12   :  { %2744 = dma.done.wait [#allocation3], 8192  }
  0x13   :  { %2745 = vsyncadd [#allocation3], 4294959104  ;;  %v3293_v0 = vmov 0.0   ;;  %v32_v1 = vld [vmem:[%s3289_s1] sm:$0xff]  ;;  %vm133_vm0 = vcmask 1043456   ;;  %v33_v2 = vld [vmem:[%s3289_s1 + $0x8] sm:$0xff] }
  0x14   :  { %206 = vmatprep.mubr.f32.mxu0 %v3293_v0  ;;  %283 = vmatprep.mubr.f32.mxu1 %v3293_v0  ;;  %v99_v3 = vld [vmem:[%s3288_s0] sm:$0xff]  ;;  %v124_v4 = vcombine.high %v32_v1, %v32_v1  ;;  %v125_v5 = vcombine.high %v33_v2, %v33_v2  ;;  %v35_v6 = vld [vmem:[#allocation2 + $0x8] sm:$0xff]  ;;  %vm126_vm1 = vcmask 31744   ;;  %v34_v11 = vld [vmem:[#allocation2] sm:$0xff]  ;;  %vm501_vm2 = vcmask 1041409  }
  0x15   :  { %v39_v7 = vld [vmem:[#allocation2 + $0x28] sm:$0xff]  ;;  %v37_v8 = vld [vmem:[#allocation2 + $0x18] sm:$0xff]  ;;  %v38_v12 = vld [vmem:[#allocation2 + $0x20] sm:$0xff] }
  0x16   :  { %v2801_v9 = vpack.c.bf16 %v39_v7, %v35_v6  ;;  %v41_v10 = vld [vmem:[#allocation2 + $0x38] sm:$0xff]  ;;  %2021 = vmatprep.subr.msk.mxu0 %vm133_vm0, %v124_v4  ;;  %2025 = vmatprep.subr.msk.mxu1 %vm133_vm0, %v125_v5  ;;  %v2807_v14 = vpack.c.bf16 %v38_v12, %v34_v11  ;;  %v36_v15 = vld [vmem:[#allocation2 + $0x10] sm:$0xff]  ;;  %v43_v17 = vld [vmem:[#allocation2 + $0x48] sm:$0xff] }
  0x17   :  { %v2805_v13 = vpack.c.bf16 %v41_v10, %v37_v8  ;;  %v40_v16 = vld [vmem:[#allocation2 + $0x30] sm:$0xff]  ;;  %2022 = vmatpush1.msk.msra.mxu0 %vm133_vm0, %v32_v1  ;;  %2026 = vmatpush1.msk.msra.mxu1 %vm133_vm0, %v33_v2  ;;  %v47_v19 = vld [vmem:[#allocation2 + $0x68] sm:$0xff]  ;;  %v45_v20 = vld [vmem:[#allocation2 + $0x58] sm:$0xff] }
  0x18   :  { %v2811_v18 = vpack.c.bf16 %v40_v16, %v36_v15  ;;  %v49_v21 = vld [vmem:[#allocation2 + $0x78] sm:$0xff]  ;;  %2023 = vmatmul.mubr.msk.f32.vlgmr.msra.gmra.mrb[0].mxu0 %vm126_vm1, %v99_v3  ;;  %2030 = vmatprep.subr.bf16.mxu0 %v2801_v9  ;;  %v2815_v22 = vpack.c.bf16 %v47_v19, %v43_v17  ;;  %v42_v24 = vld [vmem:[#allocation2 + $0x40] sm:$0xff]  ;;  %v44_v26 = vld [vmem:[#allocation2 + $0x50] sm:$0xff] }
  0x19   :  { %v2817_v23 = vpack.c.bf16 %v49_v21, %v45_v20  ;;  %v46_v25 = vld [vmem:[#allocation2 + $0x60] sm:$0xff]  ;;  %2062 = vmatprep.subr.bf16.mxu1 %v2805_v13  ;;  %2027 = vmatmul.mubr.msk.f32.vlgmr.msra.gmra.mrb[0].mxu1 %vm126_vm1, %v99_v3  ;;  %v48_v27 = vld [vmem:[#allocation2 + $0x70] sm:$0xff]  ;;  %v51_v28 = vld [vmem:[#allocation2 + $0x88] sm:$0xff] }
  0x1a   :  { %v55_v29 = vld [vmem:[#allocation2 + $0xa8] sm:$0xff]  ;;  %2032 = vmatpush1.bf16.msra.mxu0 %v2807_v14  ;;  %2064 = vmatpush1.bf16.msra.mxu1 %v2811_v18  ;;  %v2823_v30 = vpack.c.bf16 %v46_v25, %v42_v24  ;;  %v2825_v31 = vpack.c.bf16 %v48_v27, %v44_v26  ;;  %v53_v32 = vld [vmem:[#allocation2 + $0x98] sm:$0xff]  ;;  %v50_v34 = vld [vmem:[#allocation2 + $0x80] sm:$0xff] }
  0x1b   :  { %v57_v33 = vld [vmem:[#allocation2 + $0xb8] sm:$0xff]  ;;  %2034 = vmatprep.subr.bf16.mxu0 %v2815_v22  ;;  %2066 = vmatprep.subr.bf16.mxu1 %v2817_v23  ;;  %v2829_v35 = vpack.c.bf16 %v55_v29, %v51_v28  ;;  %v54_v37 = vld [vmem:[#allocation2 + $0xa0] sm:$0xff]  ;;  %v52_v38 = vld [vmem:[#allocation2 + $0x90] sm:$0xff] }
  0x1c   :  { %v2831_v36 = vpack.c.bf16 %v57_v33, %v53_v32  ;;  %v56_v39 = vld [vmem:[#allocation2 + $0xb0] sm:$0xff]  ;;  %v59_v40 = vld [vmem:[#allocation2 + $0xc8] sm:$0xff]  ;;  %v61_v42 = vld [vmem:[#allocation2 + $0xd8] sm:$0xff]  ;;  %212 = vmatprep.mubr.f32.mxu0 %v3293_v0  ;;  %289 = vmatprep.mubr.f32.mxu1 %v3293_v0  ;;  %v2837_v44 = vpack.c.bf16 %v54_v37, %v50_v34 }
  0x1d   :  { %v63_v41 = vld [vmem:[#allocation2 + $0xe8] sm:$0xff]  ;;  %v65_v43 = vld [vmem:[#allocation2 + $0xf8] sm:$0xff]  ;;  %v2839_v45 = vpack.c.bf16 %v56_v39, %v52_v38  ;;  %v58_v46 = vld [vmem:[#allocation2 + $0xc0] sm:$0xff] }
  0x1e   :  { %2036 = vmatpush1.bf16.msra.mxu0 %v2823_v30  ;;  %2068 = vmatpush1.bf16.msra.mxu1 %v2825_v31  ;;  %v62_v47 = vld [vmem:[#allocation2 + $0xe0] sm:$0xff]  ;;  %v2843_v48 = vpack.c.bf16 %v63_v41, %v59_v40  ;;  %v2845_v49 = vpack.c.bf16 %v65_v43, %v61_v42  ;;  %v60_v50 = vld [vmem:[#allocation2 + $0xd0] sm:$0xff]  ;;  %v67_v52 = vld [vmem:[#allocation2 + $0x108] sm:$0xff] }
  0x1f   :  { %2038 = vmatprep.subr.bf16.mxu0 %v2829_v35  ;;  %2070 = vmatprep.subr.bf16.mxu1 %v2831_v36  ;;  %v64_v51 = vld [vmem:[#allocation2 + $0xf0] sm:$0xff]  ;;  %v71_v53 = vld [vmem:[#allocation2 + $0x128] sm:$0xff]  ;;  %v69_v54 = vld [vmem:[#allocation2 + $0x118] sm:$0xff]  ;;  %v2849_v56 = vpack.c.bf16 %v62_v47, %v58_v46 }
  0x20   :  { %v73_v55 = vld [vmem:[#allocation2 + $0x138] sm:$0xff]  ;;  %v2851_v57 = vpack.c.bf16 %v64_v51, %v60_v50  ;;  %v66_v58 = vld [vmem:[#allocation2 + $0x100] sm:$0xff]  ;;  %v2855_v60 = vpack.c.bf16 %v71_v53, %v67_v52  ;;  %v68_v62 = vld [vmem:[#allocation2 + $0x110] sm:$0xff] }
  0x21   :  { %v70_v59 = vld [vmem:[#allocation2 + $0x120] sm:$0xff]  ;;  %v2857_v61 = vpack.c.bf16 %v73_v55, %v69_v54  ;;  %v72_v63 = vld [vmem:[#allocation2 + $0x130] sm:$0xff]  ;;  %v75_v1 = vld [vmem:[#allocation2 + $0x148] sm:$0xff] }
  0x22   :  { %2040 = vmatpush1.bf16.msra.mxu0 %v2837_v44  ;;  %2072 = vmatpush1.bf16.msra.mxu1 %v2839_v45  ;;  %v79_v2 = vld [vmem:[#allocation2 + $0x168] sm:$0xff]  ;;  %v77_v3 = vld [vmem:[#allocation2 + $0x158] sm:$0xff]  ;;  %v2861_v5 = vpack.c.bf16 %v70_v59, %v66_v58  ;;  %v2863_v6 = vpack.c.bf16 %v72_v63, %v68_v62  ;;  %v74_v7 = vld [vmem:[#allocation2 + $0x140] sm:$0xff]  ;;  %v102_v62 = vlaneseq }
  0x23   :  { %2042 = vmatprep.subr.bf16.mxu0 %v2843_v48  ;;  %2074 = vmatprep.subr.bf16.mxu1 %v2845_v49  ;;  %v81_v4 = vld [vmem:[#allocation2 + $0x178] sm:$0xff]  ;;  %v78_v8 = vld [vmem:[#allocation2 + $0x160] sm:$0xff]  ;;  %v2870_v11 = vpack.c.bf16 %v79_v2, %v75_v1  ;;  %v76_v15 = vld [vmem:[#allocation2 + $0x150] sm:$0xff] }
  0x24   :  { %v100_v10 = vld [vmem:[%s3288_s0 + $0x8] sm:$0xff]  ;;  %v2872_v12 = vpack.c.bf16 %v81_v4, %v77_v3  ;;  %v80_v16 = vld [vmem:[#allocation2 + $0x170] sm:$0xff]  ;;  %v83_v17 = vld [vmem:[#allocation2 + $0x188] sm:$0xff]  ;;  %v2880_v24 = vpack.c.bf16 %v78_v8, %v74_v7  ;;  %v103_v4 = vshrl.u32 %v102_v62, 7 }
  0x25   :  { %v87_v19 = vld [vmem:[#allocation2 + $0x1a8] sm:$0xff]  ;;  %v85_v20 = vld [vmem:[#allocation2 + $0x198] sm:$0xff]  ;;  %2024 = vmatmul.mubr.msk.f32.gmra.mrb[2].mxu0 %vm126_vm1, %v100_v10  ;;  %2028 = vmatmul.mubr.msk.f32.gmra.mrb[2].mxu1 %vm126_vm1, %v100_v10  ;;  %v2882_v25 = vpack.c.bf16 %v80_v16, %v76_v15  ;;  %v82_v26 = vld [vmem:[#allocation2 + $0x180] sm:$0xff] }
  0x26   :  { %2044 = vmatpush1.bf16.msra.mxu0 %v2849_v56  ;;  %2076 = vmatpush1.bf16.msra.mxu1 %v2851_v57  ;;  %v89_v21 = vld [vmem:[#allocation2 + $0x1b8] sm:$0xff]  ;;  %v86_v27 = vld [vmem:[#allocation2 + $0x1a0] sm:$0xff]  ;;  %v2886_v28 = vpack.c.bf16 %v87_v19, %v83_v17  ;;  %v84_v32 = vld [vmem:[#allocation2 + $0x190] sm:$0xff]  ;;  %v104_v7 = vsub.s32 0, %v103_v4  ;;  %v108_v10 = vsub.s32 1, %v103_v4  ;;  %v112_v15 = vsub.s32 2, %v103_v4 }
  0x27   :  { %2046 = vmatprep.subr.bf16.mxu0 %v2855_v60  ;;  %2078 = vmatprep.subr.bf16.mxu1 %v2857_v61  ;;  %v2888_v29 = vpack.c.bf16 %v89_v21, %v85_v20  ;;  %v88_v33 = vld [vmem:[#allocation2 + $0x1b0] sm:$0xff]  ;;  %v91_v34 = vld [vmem:[#allocation2 + $0x1c8] sm:$0xff]  ;;  %v93_v38 = vld [vmem:[#allocation2 + $0x1d8] sm:$0xff]  ;;  %v2892_v40 = vpack.c.bf16 %v86_v27, %v82_v26 }
  0x28   :  { %360 = vmatprep.mubr.f32.mxu0 %v3293_v0  ;;  %431 = vmatprep.mubr.f32.mxu1 %v3293_v0  ;;  %v95_v37 = vld [vmem:[#allocation2 + $0x1e8] sm:$0xff]  ;;  %v97_v39 = vld [vmem:[#allocation2 + $0x1f8] sm:$0xff]  ;;  %v2894_v41 = vpack.c.bf16 %v88_v33, %v84_v32  ;;  %v90_v42 = vld [vmem:[#allocation2 + $0x1c0] sm:$0xff]  ;;  %v116_v33 = vsub.s32 3, %v103_v4 }
  0x29   :  { %v2898_v43 = vpack.c.bf16 %v95_v37, %v91_v34  ;;  %v2900_v46 = vpack.c.bf16 %v97_v39, %v93_v38  ;;  %v94_v47 = vld [vmem:[#allocation2 + $0x1e0] sm:$0xff]  ;;  %v92_v50 = vld [vmem:[#allocation2 + $0x1d0] sm:$0xff]  ;;  %v98_v8 = vld [vmem:[%s3291_s3] sm:$0xf]  ;;  %s2752_s3 = smov [#allocation5]  }
  0x2a   :  { %2048 = vmatpush1.bf16.msra.mxu0 %v2861_v5  ;;  %2080 = vmatpush1.bf16.msra.mxu1 %v2863_v6  ;;  %v96_v51 = vld [vmem:[#allocation2 + $0x1f0] sm:$0xff]  ;;  %v2904_v52 = vpack.c.bf16 %v94_v47, %v90_v42  ;;  %v105_v16 = vrot.slane %v98_v8, %v104_v7  ;;  %v109_v17 = vrot.slane %v98_v8, %v108_v10  ;;  %s2012_s10 = sshll.u32 %s2752_s3, 4  ;;  %s2013_s10 = int_to_ptr.vmem [resolvable:$true] %s2012_s10 }
  0x2b   :  { %2050 = vmatprep.subr.bf16.mxu0 %v2870_v11  ;;  %2082 = vmatprep.subr.bf16.mxu1 %v2872_v12  ;;  %v2906_v53 = vpack.c.bf16 %v96_v51, %v92_v50  ;;  %v113_v19 = vrot.slane %v98_v8, %v112_v15  ;;  %v117_v10 = vrot.slane %v98_v8, %v116_v33  ;;  %s2722_s11 = scalar_lea.vmem %s2013_s10, 32  ;;  %p2727_p9 = scmp.lt.s32.totalorder %s2013_s10, %s2013_s10 }
  0x2c   :  { %p2723_p8 = scmp.ne.s32.totalorder %s2013_s10, %s2722_s11  ;;  %p2728_p10 = scmp.lt.s32.totalorder %s2722_s11, %s2722_s11 }
  0x2e   :  { %2052 = vmatpush1.bf16.msra.mxu0 %v2880_v24  ;;  %2084 = vmatpush1.bf16.msra.mxu1 %v2882_v25  ;;  %p2729_p11 = por %p2728_p10, %p2727_p9 }
  0x2f   :  { %2054 = vmatprep.subr.bf16.mxu0 %v2886_v28  ;;  %2086 = vmatprep.subr.bf16.mxu1 %v2888_v29 }
  0x30   :  { %p2730_p12 = pnand %p2729_p11, %p2723_p8 }
  0x32   :  { %2056 = vmatpush1.bf16.msra.mxu0 %v2892_v40  ;;  %2088 = vmatpush1.bf16.msra.mxu1 %v2894_v41 }
  0x33   :  { %2058 = vmatprep.subr.bf16.mxu0 %v2898_v43  ;;  %2090 = vmatprep.subr.bf16.mxu1 %v2900_v46 }
  0x36   :  { %2060 = vmatpush1.bf16.msra.mxu0 %v2904_v52  ;;  %2092 = vmatpush1.bf16.msra.mxu1 %v2906_v53 }
  0x37   :  { %2094 = vmatprep.subr.bf16.mxu0 %v2801_v9  ;;  %2126 = vmatprep.subr.bf16.mxu1 %v2805_v13 }
  0x39   :  { %361 = vmatmul.mubr.f32.vlgmr.msra.gmra.mrb[4].mxu0 %v3293_v0  ;;  %432 = vmatmul.mubr.f32.vlgmr.msra.gmra.mrb[4].mxu1 %v3293_v0 }
  0x3a   :  { %2096 = vmatpush1.bf16.msra.mxu0 %v2807_v14  ;;  %2128 = vmatpush1.bf16.msra.mxu1 %v2811_v18 }
  0x3b   :  { %2098 = vmatprep.subr.bf16.mxu0 %v2815_v22  ;;  %2130 = vmatprep.subr.bf16.mxu1 %v2817_v23 }
  0x3c   :  { %568 = vmatprep.mubr.f32.mxu0 %v3293_v0  ;;  %639 = vmatprep.mubr.f32.mxu1 %v3293_v0 }
  0x3e   :  { %2100 = vmatpush1.bf16.msra.mxu0 %v2823_v30  ;;  %2132 = vmatpush1.bf16.msra.mxu1 %v2825_v31 }
  0x3f   :  { %2102 = vmatprep.subr.bf16.mxu0 %v2829_v35  ;;  %2134 = vmatprep.subr.bf16.mxu1 %v2831_v36 }
  0x42   :  { %2104 = vmatpush1.bf16.msra.mxu0 %v2837_v44  ;;  %2136 = vmatpush1.bf16.msra.mxu1 %v2839_v45 }
  0x43   :  { %2106 = vmatprep.subr.bf16.mxu0 %v2843_v48  ;;  %2138 = vmatprep.subr.bf16.mxu1 %v2845_v49 }
  0x46   :  { %2108 = vmatpush1.bf16.msra.mxu0 %v2849_v56  ;;  %2140 = vmatpush1.bf16.msra.mxu1 %v2851_v57 }
  0x47   :  { %2110 = vmatprep.subr.bf16.mxu0 %v2855_v60  ;;  %2142 = vmatprep.subr.bf16.mxu1 %v2857_v61 }
  0x4a   :  { %2112 = vmatpush1.bf16.msra.mxu0 %v2861_v5  ;;  %2144 = vmatpush1.bf16.msra.mxu1 %v2863_v6 }
  0x4b   :  { %2114 = vmatprep.subr.bf16.mxu0 %v2870_v11  ;;  %2146 = vmatprep.subr.bf16.mxu1 %v2872_v12 }
  0x4e   :  { %2116 = vmatpush1.bf16.msra.mxu0 %v2880_v24  ;;  %2148 = vmatpush1.bf16.msra.mxu1 %v2882_v25 }
  0x4f   :  { %2118 = vmatprep.subr.bf16.mxu0 %v2886_v28  ;;  %2150 = vmatprep.subr.bf16.mxu1 %v2888_v29 }
  0x52   :  { %2120 = vmatpush1.bf16.msra.mxu0 %v2892_v40  ;;  %2152 = vmatpush1.bf16.msra.mxu1 %v2894_v41 }
  0x53   :  { %2122 = vmatprep.subr.bf16.mxu0 %v2898_v43  ;;  %2154 = vmatprep.subr.bf16.mxu1 %v2900_v46 }
  0x56   :  { %2124 = vmatpush1.bf16.msra.mxu0 %v2904_v52  ;;  %2156 = vmatpush1.bf16.msra.mxu1 %v2906_v53 }
  0x57   :  { %2158 = vmatprep.subr.bf16.mxu0 %v2801_v9  ;;  %2190 = vmatprep.subr.bf16.mxu1 %v2805_v13 }
  0xeb   :  { %v208_v54 = vpop.f32.mrb[0].mxu0 }
  0xec   :  { %v210_v55 = vpop.f32.mrb[1].mxu0  ;;  %v285_v58 = vpop.f32.mrb[0].mxu1  ;;  %v2953_v20 = vadd.f32 %v208_v54, %v105_v16 }
  0xed   :  { %v287_v59 = vpop.f32.mrb[1].mxu1  ;;  %v2955_v21 = vadd.f32 %v210_v55, %v109_v17  ;;  %v2957_v26 = vadd.f32 %v285_v58, %v113_v19 }
  0xf8   :  { %v214_v63 = vpop.f32.mrb[2].mxu0  ;;  %v291_v1 = vpop.f32.mrb[2].mxu1 }
  0xf9   :  { %v216_v2 = vpop.f32.mrb[3].mxu0  ;;  %v293_v3 = vpop.f32.mrb[3].mxu1  ;;  %v2959_v34 = vadd.f32 %v214_v63, %v105_v16  ;;  %v2966_v55 = vadd.f32 %v291_v1, %v113_v19  ;;  %v2973_v19 = vadd.f32 %v287_v59, %v117_v10 }
  0xfa   :  { %v2962_v47 = vadd.f32 %v216_v2, %v109_v17  ;;  %v2971_v17 = vadd.f32 %v293_v3, %v117_v10 }
  0xfc   :  { %3297 = vst [vmem:[#allocation8_spill] sm:$0xff] %v2971_v17 }
 0x10c   :  { %v362_v27 = vpop.f32.mrb[4].mxu0  ;;  %v433_v32 = vpop.f32.mrb[4].mxu1 }
 0x10d   :  { %v442_v37 = vrot.slane %v362_v27, 1  ;;  %v454_v38 = vadd.f32 %v362_v27, %v2953_v20  ;;  %v364_v39 = vpop.f32.mrb[5].mxu0  ;;  %v435_v42 = vpop.f32.mrb[5].mxu1  ;;  %v456_v50 = vadd.f32 %v433_v32, %v2957_v26  ;;  %v444_v4 = vrot.slane %v433_v32, 1 }
 0x10e   :  { %v443_v51 = vrot.slane %v364_v39, 1  ;;  %v455_v54 = vadd.f32 %v364_v39, %v2955_v21  ;;  %v445_v1 = vrot.slane %v435_v42, 1  ;;  %v457_v27 = vadd.f32 %v435_v42, %v2973_v19 }
 0x10f   :  { %v458_v58 = vadd.f32 %v442_v37, %v2959_v34  ;;  %v462_v62 = vmul.f32 0.5, %v454_v38  ;;  %v460_v16 = vadd.f32 %v444_v4, %v2966_v55 }
 0x110   :  { %v459_v63 = vadd.f32 %v443_v51, %v2962_v47  ;;  %v470_v7 = vmul.f32 0.5, %v455_v54  ;;  %v461_v32 = vadd.f32 %v445_v1, %v2971_v17  ;;  %v480_v33 = vmul.f32 0.5, %v457_v27 }
 0x111   :  { %v463_v15 = vmul.f32 0.5, %v458_v58  ;;  %2548 = vtanh.f32 %v462_v62 }
 0x112   :  { %2550 = vtanh.f32 %v456_v50  ;;  %v471_v2 = vmul.f32 0.5, %v459_v63  ;;  %v481_v39 = vmul.f32 0.5, %v461_v32 }
 0x113   :  { %2552 = vtanh.f32 %v463_v15 }
 0x114   :  { %2554 = vtanh.f32 %v470_v7 }
 0x115   :  { %2556 = vtanh.f32 %v471_v2 }
 0x116   :  { %2558 = vtanh.f32 %v460_v16 }
 0x117   :  { %2560 = vtanh.f32 %v480_v33 }
 0x118   :  { %2562 = vtanh.f32 %v481_v39 }
 0x11b   :  { %v2549_v8 = vpop.eup %2548 }
 0x11c   :  { %v2551_v37 = vpop.eup %2550  ;;  %v466_v38 = vadd.f32 1.0, %v2549_v8 }
 0x11d   :  { %v2553_v50 = vpop.eup %2552 }
 0x11e   :  { %v2555_v51 = vpop.eup %2554  ;;  %v467_v54 = vadd.f32 1.0, %v2553_v50  ;;  %v468_v3 = vmul.f32 0.5, %v466_v38 }
 0x11f   :  { %v2557_v58 = vpop.eup %2556  ;;  %v474_v62 = vadd.f32 1.0, %v2555_v51 }
 0x120   :  { %v469_v59 = vmul.f32 0.5, %v467_v54  ;;  %v475_v4 = vadd.f32 1.0, %v2557_v58  ;;  %v490_v63 = vmul.f32 %v2551_v37, %v468_v3  ;;  %v2559_v7 = vpop.eup %2558 }
 0x121   :  { %v476_v42 = vmul.f32 0.5, %v474_v62  ;;  %v2561_v8 = vpop.eup %2560 }
 0x122   :  { %v477_v10 = vmul.f32 0.5, %v475_v4  ;;  %v491_v15 = vmul.f32 %v2559_v7, %v469_v59  ;;  %v2563_v38 = vpop.eup %2562  ;;  %v484_v37 = vadd.f32 1.0, %v2561_v8 }
 0x123   :  { %v488_v2 = vmul.f32 0.0, %v476_v42  ;;  %v485_v39 = vadd.f32 1.0, %v2563_v38 }
 0x124   :  { %v489_v16 = vmul.f32 0.0, %v477_v10  ;;  %v486_v50 = vmul.f32 0.5, %v484_v37 }
 0x125   :  { %v492_v1 = vadd.f32 %v490_v63, %v488_v2  ;;  %v487_v54 = vmul.f32 0.5, %v485_v39 }
 0x126   :  { %v493_v27 = vadd.f32 %v491_v15, %v489_v16 }
 0x127   :  { %2564 = vtanh.f32 %v492_v1 }
 0x128   :  { %2566 = vtanh.f32 %v493_v27  ;;  %v500_v32 = vrot.slane %v493_v27, 7 }
 0x12a   :  { %v502_v33 = vsel %vm501_vm2, %v500_v32, %v492_v1 }
 0x12b   :  { %569 = vmatmul.mubr.f32.vlgmr.msra.gmra.mrb[6].mxu0 %v502_v33  ;;  %640 = vmatmul.mubr.f32.vlgmr.msra.gmra.mrb[6].mxu1 %v502_v33 }
 0x12c   :  { %2160 = vmatpush1.bf16.msra.mxu0 %v2807_v14  ;;  %2192 = vmatpush1.bf16.msra.mxu1 %v2811_v18 }
 0x12d   :  { %2162 = vmatprep.subr.bf16.mxu0 %v2815_v22  ;;  %2194 = vmatprep.subr.bf16.mxu1 %v2817_v23 }
 0x12e   :  { %781 = vmatprep.mubr.f32.mxu0 %v3293_v0  ;;  %852 = vmatprep.mubr.f32.mxu1 %v3293_v0 }
 0x130   :  { %2164 = vmatpush1.bf16.msra.mxu0 %v2823_v30  ;;  %2196 = vmatpush1.bf16.msra.mxu1 %v2825_v31 }
 0x131   :  { %v2565_v51 = vpop.eup %2564  ;;  %2166 = vmatprep.subr.bf16.mxu0 %v2829_v35  ;;  %2198 = vmatprep.subr.bf16.mxu1 %v2831_v36 }
 0x132   :  { %v2567_v3 = vpop.eup %2566  ;;  %v2988_v58 = vmul.f32 %v2565_v51, %v486_v50 }
 0x133   :  { %v2990_v62 = vmul.f32 %v2567_v3, %v487_v54 }
 0x134   :  { %2168 = vmatpush1.bf16.msra.mxu0 %v2837_v44  ;;  %2200 = vmatpush1.bf16.msra.mxu1 %v2839_v45 }
 0x135   :  { %2170 = vmatprep.subr.bf16.mxu0 %v2843_v48  ;;  %2202 = vmatprep.subr.bf16.mxu1 %v2845_v49 }
 0x138   :  { %2172 = vmatpush1.bf16.msra.mxu0 %v2849_v56  ;;  %2204 = vmatpush1.bf16.msra.mxu1 %v2851_v57 }
 0x139   :  { %2174 = vmatprep.subr.bf16.mxu0 %v2855_v60  ;;  %2206 = vmatprep.subr.bf16.mxu1 %v2857_v61 }
 0x13c   :  { %2176 = vmatpush1.bf16.msra.mxu0 %v2861_v5  ;;  %2208 = vmatpush1.bf16.msra.mxu1 %v2863_v6 }
 0x13d   :  { %2178 = vmatprep.subr.bf16.mxu0 %v2870_v11  ;;  %2210 = vmatprep.subr.bf16.mxu1 %v2872_v12 }
 0x140   :  { %2180 = vmatpush1.bf16.msra.mxu0 %v2880_v24  ;;  %2212 = vmatpush1.bf16.msra.mxu1 %v2882_v25 }
 0x141   :  { %2182 = vmatprep.subr.bf16.mxu0 %v2886_v28  ;;  %2214 = vmatprep.subr.bf16.mxu1 %v2888_v29 }
 0x144   :  { %2184 = vmatpush1.bf16.msra.mxu0 %v2892_v40  ;;  %2216 = vmatpush1.bf16.msra.mxu1 %v2894_v41 }
 0x145   :  { %2186 = vmatprep.subr.bf16.mxu0 %v2898_v43  ;;  %2218 = vmatprep.subr.bf16.mxu1 %v2900_v46 }
 0x148   :  { %2188 = vmatpush1.bf16.msra.mxu0 %v2904_v52  ;;  %2220 = vmatpush1.bf16.msra.mxu1 %v2906_v53 }
 0x149   :  { %2222 = vmatprep.subr.bf16.mxu0 %v2801_v9  ;;  %2254 = vmatprep.subr.bf16.mxu1 %v2805_v13 }
 0x1fe   :  { %v570_v59 = vpop.f32.mrb[6].mxu0  ;;  %v641_v4 = vpop.f32.mrb[6].mxu1 }
 0x1ff   :  { %v650_v63 = vrot.slane %v570_v59, 7  ;;  %v666_v7 = vadd.f32 %v570_v59, %v2959_v34  ;;  %v572_v42 = vpop.f32.mrb[7].mxu0  ;;  %v643_v10 = vpop.f32.mrb[7].mxu1  ;;  %v668_v15 = vadd.f32 %v641_v4, %v2966_v55  ;;  %v652_v32 = vrot.slane %v641_v4, 7 }
 0x200   :  { %v651_v2 = vrot.slane %v572_v42, 7  ;;  %v667_v16 = vadd.f32 %v572_v42, %v2962_v47  ;;  %v653_v50 = vrot.slane %v643_v10, 7  ;;  %v669_v54 = vadd.f32 %v643_v10, %v2971_v17 }
 0x201   :  { %v662_v1 = vadd.f32 %v650_v63, %v2953_v20  ;;  %v671_v27 = vmul.f32 0.5, %v666_v7  ;;  %v664_v39 = vadd.f32 %v652_v32, %v2957_v26 }
 0x202   :  { %v663_v8 = vadd.f32 %v651_v2, %v2955_v21  ;;  %v679_v33 = vmul.f32 0.5, %v667_v16  ;;  %v665_v51 = vadd.f32 %v653_v50, %v2973_v19  ;;  %v689_v7 = vmul.f32 0.5, %v669_v54 }
 0x203   :  { %v670_v38 = vmul.f32 0.5, %v662_v1  ;;  %2568 = vtanh.f32 %v671_v27  ;;  %v699_v50 = vrot.slane %v2990_v62, 7 }
 0x204   :  { %2570 = vtanh.f32 %v668_v15  ;;  %v678_v37 = vmul.f32 0.5, %v663_v8  ;;  %v688_v59 = vmul.f32 0.5, %v665_v51 }
 0x205   :  { %2572 = vtanh.f32 %v670_v38 }
 0x206   :  { %2574 = vtanh.f32 %v678_v37  ;;  %v698_v37 = vrot.slane %v2988_v58, 7 }
 0x207   :  { %2576 = vtanh.f32 %v679_v33 }
 0x208   :  { %2578 = vtanh.f32 %v664_v39 }
 0x209   :  { %2580 = vtanh.f32 %v688_v59 }
 0x20a   :  { %2582 = vtanh.f32 %v689_v7  ;;  %v3298_v7 = vmov 0.0  }
 0x20d   :  { %v2569_v3 = vpop.eup %2568 }
 0x20e   :  { %v2571_v4 = vpop.eup %2570  ;;  %v675_v63 = vadd.f32 1.0, %v2569_v3 }
 0x20f   :  { %v2573_v42 = vpop.eup %2572 }
 0x210   :  { %v2575_v2 = vpop.eup %2574  ;;  %v674_v15 = vadd.f32 1.0, %v2573_v42  ;;  %v677_v16 = vmul.f32 0.5, %v675_v63 }
 0x211   :  { %v2577_v1 = vpop.eup %2576  ;;  %v682_v27 = vadd.f32 1.0, %v2575_v2 }
 0x212   :  { %v676_v32 = vmul.f32 0.5, %v674_v15  ;;  %v683_v8 = vadd.f32 1.0, %v2577_v1  ;;  %v705_v38 = vmul.f32 %v2571_v4, %v677_v16  ;;  %v2579_v33 = vpop.eup %2578 }
 0x213   :  { %v684_v10 = vmul.f32 0.5, %v682_v27  ;;  %v2581_v59 = vpop.eup %2580 }
 0x214   :  { %v685_v39 = vmul.f32 0.5, %v683_v8  ;;  %v704_v51 = vmul.f32 %v2579_v33, %v676_v32  ;;  %v2583_v4 = vpop.eup %2582  ;;  %v692_v58 = vadd.f32 1.0, %v2581_v59 }
 0x215   :  { %v702_v54 = vmul.f32 %v698_v37, %v684_v10  ;;  %v693_v62 = vadd.f32 1.0, %v2583_v4 }
 0x216   :  { %v703_v3 = vmul.f32 %v699_v50, %v685_v39 }
 0x217   :  { %v706_v0 = vadd.f32 %v704_v51, %v702_v54  ;;  %v695_v16 = vmul.f32 0.5, %v693_v62 }
 0x218   :  { %v707_v42 = vadd.f32 %v705_v38, %v703_v3 }
 0x219   :  { %2584 = vtanh.f32 %v706_v0  ;;  %v714_v63 = vrot.slane %v706_v0, 1  ;;  %v694_v0 = vmul.f32 0.5, %v692_v58 }
 0x21a   :  { %2586 = vtanh.f32 %v707_v42 }
 0x21b   :  { %v715_v2 = vsel %vm501_vm2, %v707_v42, %v714_v63 }
 0x21c   :  { %782 = vmatmul.mubr.f32.vlgmr.msra.gmra.mrb[8].mxu0 %v715_v2  ;;  %853 = vmatmul.mubr.f32.vlgmr.msra.gmra.mrb[8].mxu1 %v715_v2 }
 0x21d   :  { %2224 = vmatpush1.bf16.msra.mxu0 %v2807_v14  ;;  %2256 = vmatpush1.bf16.msra.mxu1 %v2811_v18 }
 0x21e   :  { %2226 = vmatprep.subr.bf16.mxu0 %v2815_v22  ;;  %2258 = vmatprep.subr.bf16.mxu1 %v2817_v23 }
 0x21f   :  { %999 = vmatprep.mubr.f32.mxu0 %v3298_v7  ;;  %1070 = vmatprep.mubr.f32.mxu1 %v3298_v7 }
 0x221   :  { %2228 = vmatpush1.bf16.msra.mxu0 %v2823_v30  ;;  %2260 = vmatpush1.bf16.msra.mxu1 %v2825_v31 }
 0x222   :  { %2230 = vmatprep.subr.bf16.mxu0 %v2829_v35  ;;  %2262 = vmatprep.subr.bf16.mxu1 %v2831_v36 }
 0x223   :  { %v2585_v15 = vpop.eup %2584 }
 0x224   :  { %v2587_v1 = vpop.eup %2586  ;;  %v3037_v27 = vmul.f32 %v2585_v15, %v694_v0 }
 0x225   :  { %v3039_v32 = vmul.f32 %v2587_v1, %v695_v16  ;;  %2232 = vmatpush1.bf16.msra.mxu0 %v2837_v44  ;;  %2264 = vmatpush1.bf16.msra.mxu1 %v2839_v45 }
 0x226   :  { %2234 = vmatprep.subr.bf16.mxu0 %v2843_v48  ;;  %2266 = vmatprep.subr.bf16.mxu1 %v2845_v49 }
 0x229   :  { %2236 = vmatpush1.bf16.msra.mxu0 %v2849_v56  ;;  %2268 = vmatpush1.bf16.msra.mxu1 %v2851_v57 }
 0x22a   :  { %2238 = vmatprep.subr.bf16.mxu0 %v2855_v60  ;;  %2270 = vmatprep.subr.bf16.mxu1 %v2857_v61 }
 0x22d   :  { %2240 = vmatpush1.bf16.msra.mxu0 %v2861_v5  ;;  %2272 = vmatpush1.bf16.msra.mxu1 %v2863_v6 }
 0x22e   :  { %2242 = vmatprep.subr.bf16.mxu0 %v2870_v11  ;;  %2274 = vmatprep.subr.bf16.mxu1 %v2872_v12 }
 0x231   :  { %2244 = vmatpush1.bf16.msra.mxu0 %v2880_v24  ;;  %2276 = vmatpush1.bf16.msra.mxu1 %v2882_v25 }
 0x232   :  { %2246 = vmatprep.subr.bf16.mxu0 %v2886_v28  ;;  %2278 = vmatprep.subr.bf16.mxu1 %v2888_v29 }
 0x235   :  { %2248 = vmatpush1.bf16.msra.mxu0 %v2892_v40  ;;  %2280 = vmatpush1.bf16.msra.mxu1 %v2894_v41 }
 0x236   :  { %2250 = vmatprep.subr.bf16.mxu0 %v2898_v43  ;;  %2282 = vmatprep.subr.bf16.mxu1 %v2900_v46 }
 0x239   :  { %2252 = vmatpush1.bf16.msra.mxu0 %v2904_v52  ;;  %2284 = vmatpush1.bf16.msra.mxu1 %v2906_v53 }
 0x23a   :  { %2286 = vmatprep.subr.bf16.mxu0 %v2801_v9  ;;  %2318 = vmatprep.subr.bf16.mxu1 %v2805_v13 }
 0x2ef   :  { %v783_v8 = vpop.f32.mrb[8].mxu0  ;;  %v854_v38 = vpop.f32.mrb[8].mxu1 }
 0x2f0   :  { %v863_v33 = vrot.slane %v783_v8, 6  ;;  %v867_v37 = vrot.slane %v783_v8, 7  ;;  %v785_v10 = vpop.f32.mrb[9].mxu0  ;;  %v856_v39 = vpop.f32.mrb[9].mxu1  ;;  %v865_v42 = vrot.slane %v854_v38, 6  ;;  %v869_v63 = vrot.slane %v854_v38, 7 }
 0x2f1   :  { %v864_v50 = vrot.slane %v785_v10, 6  ;;  %v868_v51 = vrot.slane %v785_v10, 7  ;;  %v866_v1 = vrot.slane %v856_v39, 6  ;;  %v870_v8 = vrot.slane %v856_v39, 7 }
 0x2f2   :  { %v879_v54 = vadd.f32 %v863_v33, %v2953_v20  ;;  %v883_v3 = vadd.f32 %v867_v37, %v2959_v34  ;;  %v881_v15 = vadd.f32 %v865_v42, %v2957_v26  ;;  %v885_v16 = vadd.f32 %v869_v63, %v2966_v55 }
 0x2f3   :  { %v880_v59 = vadd.f32 %v864_v50, %v2955_v21  ;;  %v884_v2 = vadd.f32 %v868_v51, %v2962_v47  ;;  %v882_v38 = vadd.f32 %v866_v1, %v2973_v19  ;;  %v886_v33 = vadd.f32 %v870_v8, %v2971_v17 }
 0x2f4   :  { %v887_v4 = vmul.f32 0.5, %v879_v54  ;;  %v888_v58 = vmul.f32 0.5, %v883_v3  ;;  %v916_v1 = vrot.slane %v3039_v32, 7 }
 0x2f5   :  { %v895_v62 = vmul.f32 0.5, %v880_v59  ;;  %v896_v0 = vmul.f32 0.5, %v884_v2  ;;  %v905_v37 = vmul.f32 0.5, %v882_v38  ;;  %v906_v50 = vmul.f32 0.5, %v886_v33 }
 0x2f6   :  { %2588 = vtanh.f32 %v887_v4 }
 0x2f7   :  { %2590 = vtanh.f32 %v888_v58 }
 0x2f8   :  { %2592 = vtanh.f32 %v895_v62 }
 0x2f9   :  { %2594 = vtanh.f32 %v896_v0  ;;  %v915_v0 = vrot.slane %v3037_v27, 7 }
 0x2fa   :  { %2596 = vtanh.f32 %v881_v15 }
 0x2fb   :  { %2598 = vtanh.f32 %v885_v16 }
 0x2fc   :  { %2600 = vtanh.f32 %v905_v37 }
 0x2fd   :  { %2602 = vtanh.f32 %v906_v50 }
 0x300   :  { %v2589_v10 = vpop.eup %2588 }
 0x301   :  { %v2591_v51 = vpop.eup %2590  ;;  %v891_v54 = vadd.f32 1.0, %v2589_v10 }
 0x302   :  { %v2593_v3 = vpop.eup %2592  ;;  %v892_v42 = vadd.f32 1.0, %v2591_v51 }
 0x303   :  { %v2595_v59 = vpop.eup %2594  ;;  %v893_v2 = vmul.f32 0.5, %v891_v54  ;;  %v899_v63 = vadd.f32 1.0, %v2593_v3 }
 0x304   :  { %v2597_v4 = vpop.eup %2596  ;;  %v894_v39 = vmul.f32 0.5, %v892_v42  ;;  %v900_v58 = vadd.f32 1.0, %v2595_v59 }
 0x305   :  { %v2599_v62 = vpop.eup %2598  ;;  %v901_v15 = vmul.f32 0.5, %v899_v63  ;;  %v921_v16 = vmul.f32 %v2597_v4, %v893_v2 }
 0x306   :  { %v902_v8 = vmul.f32 0.5, %v900_v58  ;;  %v922_v38 = vmul.f32 %v2599_v62, %v894_v39  ;;  %v2601_v3 = vpop.eup %2600 }
 0x307   :  { %v919_v33 = vmul.f32 %v915_v0, %v901_v15  ;;  %v2603_v42 = vpop.eup %2602  ;;  %v909_v27 = vadd.f32 1.0, %v2601_v3 }
 0x308   :  { %v920_v10 = vmul.f32 %v916_v1, %v902_v8  ;;  %v910_v32 = vadd.f32 1.0, %v2603_v42 }
 0x309   :  { %v923_v51 = vadd.f32 %v921_v16, %v919_v33 }
 0x30a   :  { %v924_v17 = vadd.f32 %v922_v38, %v920_v10  ;;  %v912_v2 = vmul.f32 0.5, %v910_v32 }
 0x30b   :  { %2604 = vtanh.f32 %v923_v51  ;;  %v931_v54 = vrot.slane %v923_v51, 2 }
 0x30c   :  { %2606 = vtanh.f32 %v924_v17  ;;  %v932_v37 = vrot.slane %v924_v17, 1  ;;  %v911_v17 = vmul.f32 0.5, %v909_v27 }
 0x30e   :  { %v933_v50 = vsel %vm501_vm2, %v932_v37, %v931_v54 }
 0x30f   :  { %1000 = vmatmul.mubr.f32.vlgmr.msra.gmra.mrb[10].mxu0 %v933_v50  ;;  %1071 = vmatmul.mubr.f32.vlgmr.msra.gmra.mrb[10].mxu1 %v933_v50 }
 0x310   :  { %2288 = vmatpush1.bf16.msra.mxu0 %v2807_v14  ;;  %2320 = vmatpush1.bf16.msra.mxu1 %v2811_v18 }
 0x311   :  { %2290 = vmatprep.subr.bf16.mxu0 %v2815_v22  ;;  %2322 = vmatprep.subr.bf16.mxu1 %v2817_v23 }
 0x312   :  { %1217 = vmatprep.mubr.f32.mxu0 %v3298_v7  ;;  %1288 = vmatprep.mubr.f32.mxu1 %v3298_v7 }
 0x314   :  { %2292 = vmatpush1.bf16.msra.mxu0 %v2823_v30  ;;  %2324 = vmatpush1.bf16.msra.mxu1 %v2825_v31 }
 0x315   :  { %v2605_v59 = vpop.eup %2604  ;;  %2294 = vmatprep.subr.bf16.mxu0 %v2829_v35  ;;  %2326 = vmatprep.subr.bf16.mxu1 %v2831_v36 }
 0x316   :  { %v2607_v63 = vpop.eup %2606  ;;  %v3086_v4 = vmul.f32 %v2605_v59, %v911_v17 }
 0x317   :  { %v3088_v39 = vmul.f32 %v2607_v63, %v912_v2 }
 0x318   :  { %2296 = vmatpush1.bf16.msra.mxu0 %v2837_v44  ;;  %2328 = vmatpush1.bf16.msra.mxu1 %v2839_v45 }
 0x319   :  { %2298 = vmatprep.subr.bf16.mxu0 %v2843_v48  ;;  %2330 = vmatprep.subr.bf16.mxu1 %v2845_v49 }
 0x31c   :  { %2300 = vmatpush1.bf16.msra.mxu0 %v2849_v56  ;;  %2332 = vmatpush1.bf16.msra.mxu1 %v2851_v57 }
 0x31d   :  { %2302 = vmatprep.subr.bf16.mxu0 %v2855_v60  ;;  %2334 = vmatprep.subr.bf16.mxu1 %v2857_v61 }
 0x320   :  { %2304 = vmatpush1.bf16.msra.mxu0 %v2861_v5  ;;  %2336 = vmatpush1.bf16.msra.mxu1 %v2863_v6 }
 0x321   :  { %2306 = vmatprep.subr.bf16.mxu0 %v2870_v11  ;;  %2338 = vmatprep.subr.bf16.mxu1 %v2872_v12 }
 0x324   :  { %2308 = vmatpush1.bf16.msra.mxu0 %v2880_v24  ;;  %2340 = vmatpush1.bf16.msra.mxu1 %v2882_v25 }
 0x325   :  { %2310 = vmatprep.subr.bf16.mxu0 %v2886_v28  ;;  %2342 = vmatprep.subr.bf16.mxu1 %v2888_v29 }
 0x328   :  { %2312 = vmatpush1.bf16.msra.mxu0 %v2892_v40  ;;  %2344 = vmatpush1.bf16.msra.mxu1 %v2894_v41 }
 0x329   :  { %2314 = vmatprep.subr.bf16.mxu0 %v2898_v43  ;;  %2346 = vmatprep.subr.bf16.mxu1 %v2900_v46 }
 0x32c   :  { %2316 = vmatpush1.bf16.msra.mxu0 %v2904_v52  ;;  %2348 = vmatpush1.bf16.msra.mxu1 %v2906_v53 }
 0x32d   :  { %2350 = vmatprep.subr.bf16.mxu0 %v2801_v9  ;;  %2382 = vmatprep.subr.bf16.mxu1 %v2805_v13 }
 0x3e2   :  { %v1001_v58 = vpop.f32.mrb[10].mxu0  ;;  %v1072_v62 = vpop.f32.mrb[10].mxu1 }
 0x3e3   :  { %v1081_v0 = vrot.slane %v1001_v58, 5  ;;  %v1085_v15 = vrot.slane %v1001_v58, 6  ;;  %v1003_v16 = vpop.f32.mrb[11].mxu0  ;;  %v1074_v1 = vpop.f32.mrb[11].mxu1  ;;  %v1083_v51 = vrot.slane %v1072_v62, 5  ;;  %v1087_v54 = vrot.slane %v1072_v62, 6 }
 0x3e4   :  { %v1082_v8 = vrot.slane %v1003_v16, 5  ;;  %v1086_v38 = vrot.slane %v1003_v16, 6  ;;  %v1084_v2 = vrot.slane %v1074_v1, 5  ;;  %v1088_v63 = vrot.slane %v1074_v1, 6  ;;  %v3299_v62 = vld [vmem:[#allocation8_spill] sm:$0xff] }
 0x3e5   :  { %v1097_v33 = vadd.f32 %v1081_v0, %v2953_v20  ;;  %v1101_v10 = vadd.f32 %v1085_v15, %v2959_v34  ;;  %v1099_v17 = vadd.f32 %v1083_v51, %v2957_v26  ;;  %v1103_v59 = vadd.f32 %v1087_v54, %v2966_v55 }
 0x3e6   :  { %v1098_v37 = vadd.f32 %v1082_v8, %v2955_v21  ;;  %v1102_v3 = vadd.f32 %v1086_v38, %v2962_v47  ;;  %v1100_v58 = vadd.f32 %v1084_v2, %v2973_v19  ;;  %v1104_v0 = vadd.f32 %v1088_v63, %v3299_v62 }
 0x3e7   :  { %v1105_v42 = vmul.f32 0.5, %v1097_v33  ;;  %v1106_v50 = vmul.f32 0.5, %v1101_v10  ;;  %v1134_v2 = vrot.slane %v3088_v39, 7 }
 0x3e8   :  { %v1113_v27 = vmul.f32 0.5, %v1098_v37  ;;  %v1114_v32 = vmul.f32 0.5, %v1102_v3  ;;  %v1123_v15 = vmul.f32 0.5, %v1100_v58  ;;  %v1124_v8 = vmul.f32 0.5, %v1104_v0 }
 0x3e9   :  { %2608 = vtanh.f32 %v1105_v42 }
 0x3ea   :  { %2610 = vtanh.f32 %v1106_v50 }
 0x3eb   :  { %2612 = vtanh.f32 %v1113_v27 }
 0x3ec   :  { %2614 = vtanh.f32 %v1114_v32  ;;  %v1133_v32 = vrot.slane %v3086_v4, 7 }
 0x3ed   :  { %2616 = vtanh.f32 %v1099_v17 }
 0x3ee   :  { %2618 = vtanh.f32 %v1103_v59 }
 0x3ef   :  { %2620 = vtanh.f32 %v1123_v15 }
 0x3f0   :  { %2622 = vtanh.f32 %v1124_v8 }
 0x3f3   :  { %v2609_v16 = vpop.eup %2608 }
 0x3f4   :  { %v2611_v38 = vpop.eup %2610  ;;  %v1109_v33 = vadd.f32 1.0, %v2609_v16 }
 0x3f5   :  { %v2613_v10 = vpop.eup %2612  ;;  %v1110_v51 = vadd.f32 1.0, %v2611_v38 }
 0x3f6   :  { %v2615_v37 = vpop.eup %2614  ;;  %v1111_v3 = vmul.f32 0.5, %v1109_v33  ;;  %v1117_v54 = vadd.f32 1.0, %v2613_v10 }
 0x3f7   :  { %v2617_v42 = vpop.eup %2616  ;;  %v1112_v1 = vmul.f32 0.5, %v1110_v51  ;;  %v1118_v50 = vadd.f32 1.0, %v2615_v37 }
 0x3f8   :  { %v2619_v27 = vpop.eup %2618  ;;  %v1119_v17 = vmul.f32 0.5, %v1117_v54  ;;  %v1139_v59 = vmul.f32 %v2617_v42, %v1111_v3 }
 0x3f9   :  { %v1120_v63 = vmul.f32 0.5, %v1118_v50  ;;  %v1140_v58 = vmul.f32 %v2619_v27, %v1112_v1  ;;  %v2621_v10 = vpop.eup %2620 }
 0x3fa   :  { %v1137_v0 = vmul.f32 %v1133_v32, %v1119_v17  ;;  %v2623_v51 = vpop.eup %2622  ;;  %v1127_v4 = vadd.f32 1.0, %v2621_v10 }
 0x3fb   :  { %v1138_v16 = vmul.f32 %v1134_v2, %v1120_v63  ;;  %v1128_v39 = vadd.f32 1.0, %v2623_v51 }
 0x3fc   :  { %v1141_v38 = vadd.f32 %v1139_v59, %v1137_v0 }
 0x3fd   :  { %v1142_v62 = vadd.f32 %v1140_v58, %v1138_v16  ;;  %v1130_v3 = vmul.f32 0.5, %v1128_v39 }
 0x3fe   :  { %2624 = vtanh.f32 %v1141_v38  ;;  %v1149_v33 = vrot.slane %v1141_v38, 3 }
 0x3ff   :  { %2626 = vtanh.f32 %v1142_v62  ;;  %v1150_v15 = vrot.slane %v1142_v62, 2  ;;  %v1129_v62 = vmul.f32 0.5, %v1127_v4 }
 0x401   :  { %v1151_v8 = vsel %vm501_vm2, %v1150_v15, %v1149_v33 }
 0x402   :  { %1218 = vmatmul.mubr.f32.vlgmr.msra.gmra.mrb[12].mxu0 %v1151_v8  ;;  %1289 = vmatmul.mubr.f32.vlgmr.msra.gmra.mrb[12].mxu1 %v1151_v8 }
 0x403   :  { %2352 = vmatpush1.bf16.msra.mxu0 %v2807_v14  ;;  %2384 = vmatpush1.bf16.msra.mxu1 %v2811_v18 }
 0x404   :  { %2354 = vmatprep.subr.bf16.mxu0 %v2815_v22  ;;  %2386 = vmatprep.subr.bf16.mxu1 %v2817_v23 }
 0x405   :  { %1435 = vmatprep.mubr.f32.mxu0 %v3298_v7  ;;  %1506 = vmatprep.mubr.f32.mxu1 %v3298_v7 }
 0x407   :  { %2356 = vmatpush1.bf16.msra.mxu0 %v2823_v30  ;;  %2388 = vmatpush1.bf16.msra.mxu1 %v2825_v31 }
 0x408   :  { %v2625_v37 = vpop.eup %2624  ;;  %2358 = vmatprep.subr.bf16.mxu0 %v2829_v35  ;;  %2390 = vmatprep.subr.bf16.mxu1 %v2831_v36 }
 0x409   :  { %v2627_v54 = vpop.eup %2626  ;;  %v3135_v42 = vmul.f32 %v2625_v37, %v1129_v62 }
 0x40a   :  { %v3137_v1 = vmul.f32 %v2627_v54, %v1130_v3 }
 0x40b   :  { %2360 = vmatpush1.bf16.msra.mxu0 %v2837_v44  ;;  %2392 = vmatpush1.bf16.msra.mxu1 %v2839_v45 }
 0x40c   :  { %2362 = vmatprep.subr.bf16.mxu0 %v2843_v48  ;;  %2394 = vmatprep.subr.bf16.mxu1 %v2845_v49 }
 0x40f   :  { %2364 = vmatpush1.bf16.msra.mxu0 %v2849_v56  ;;  %2396 = vmatpush1.bf16.msra.mxu1 %v2851_v57 }
 0x410   :  { %2366 = vmatprep.subr.bf16.mxu0 %v2855_v60  ;;  %2398 = vmatprep.subr.bf16.mxu1 %v2857_v61 }
 0x413   :  { %2368 = vmatpush1.bf16.msra.mxu0 %v2861_v5  ;;  %2400 = vmatpush1.bf16.msra.mxu1 %v2863_v6 }
 0x414   :  { %2370 = vmatprep.subr.bf16.mxu0 %v2870_v11  ;;  %2402 = vmatprep.subr.bf16.mxu1 %v2872_v12 }
 0x417   :  { %2372 = vmatpush1.bf16.msra.mxu0 %v2880_v24  ;;  %2404 = vmatpush1.bf16.msra.mxu1 %v2882_v25 }
 0x418   :  { %2374 = vmatprep.subr.bf16.mxu0 %v2886_v28  ;;  %2406 = vmatprep.subr.bf16.mxu1 %v2888_v29 }
 0x41b   :  { %2376 = vmatpush1.bf16.msra.mxu0 %v2892_v40  ;;  %2408 = vmatpush1.bf16.msra.mxu1 %v2894_v41 }
 0x41c   :  { %2378 = vmatprep.subr.bf16.mxu0 %v2898_v43  ;;  %2410 = vmatprep.subr.bf16.mxu1 %v2900_v46 }
 0x41f   :  { %2380 = vmatpush1.bf16.msra.mxu0 %v2904_v52  ;;  %2412 = vmatpush1.bf16.msra.mxu1 %v2906_v53 }
 0x420   :  { %2414 = vmatprep.subr.bf16.mxu0 %v2801_v9  ;;  %2446 = vmatprep.subr.bf16.mxu1 %v2805_v13 }
 0x4d5   :  { %v1219_v50 = vpop.f32.mrb[12].mxu0  ;;  %v1290_v27 = vpop.f32.mrb[12].mxu1 }
 0x4d6   :  { %v1299_v32 = vrot.slane %v1219_v50, 4  ;;  %v1303_v17 = vrot.slane %v1219_v50, 5  ;;  %v1221_v59 = vpop.f32.mrb[13].mxu0  ;;  %v1292_v2 = vpop.f32.mrb[13].mxu1  ;;  %v1301_v38 = vrot.slane %v1290_v27, 4  ;;  %v1305_v33 = vrot.slane %v1290_v27, 5 }
 0x4d7   :  { %v1300_v63 = vrot.slane %v1221_v59, 4  ;;  %v1304_v58 = vrot.slane %v1221_v59, 5  ;;  %v1302_v3 = vrot.slane %v1292_v2, 4  ;;  %v1306_v54 = vrot.slane %v1292_v2, 5  ;;  %v3300_v27 = vld [vmem:[#allocation8_spill] sm:$0xff] }
 0x4d8   :  { %v1315_v0 = vadd.f32 %v1299_v32, %v2953_v20  ;;  %v1319_v16 = vadd.f32 %v1303_v17, %v2959_v34  ;;  %v1317_v62 = vadd.f32 %v1301_v38, %v2957_v26  ;;  %v1321_v37 = vadd.f32 %v1305_v33, %v2966_v55 }
 0x4d9   :  { %v1316_v15 = vadd.f32 %v1300_v63, %v2955_v21  ;;  %v1320_v10 = vadd.f32 %v1304_v58, %v2962_v47  ;;  %v1318_v50 = vadd.f32 %v1302_v3, %v2973_v19  ;;  %v1322_v32 = vadd.f32 %v1306_v54, %v3300_v27 }
 0x4da   :  { %v1323_v51 = vmul.f32 0.5, %v1315_v0  ;;  %v1324_v8 = vmul.f32 0.5, %v1319_v16  ;;  %v1352_v3 = vrot.slane %v3137_v1, 7 }
 0x4db   :  { %v1331_v4 = vmul.f32 0.5, %v1316_v15  ;;  %v1332_v39 = vmul.f32 0.5, %v1320_v10  ;;  %v1341_v17 = vmul.f32 0.5, %v1318_v50  ;;  %v1342_v63 = vmul.f32 0.5, %v1322_v32 }
 0x4dc   :  { %2628 = vtanh.f32 %v1323_v51 }
 0x4dd   :  { %2630 = vtanh.f32 %v1324_v8 }
 0x4de   :  { %2632 = vtanh.f32 %v1331_v4 }
 0x4df   :  { %2634 = vtanh.f32 %v1332_v39  ;;  %v1351_v39 = vrot.slane %v3135_v42, 7 }
 0x4e0   :  { %2636 = vtanh.f32 %v1317_v62 }
 0x4e1   :  { %2638 = vtanh.f32 %v1321_v37 }
 0x4e2   :  { %2640 = vtanh.f32 %v1341_v17 }
 0x4e3   :  { %2642 = vtanh.f32 %v1342_v63 }
 0x4e6   :  { %v2629_v59 = vpop.eup %2628 }
 0x4e7   :  { %v2631_v58 = vpop.eup %2630  ;;  %v1327_v0 = vadd.f32 1.0, %v2629_v59 }
 0x4e8   :  { %v2633_v16 = vpop.eup %2632  ;;  %v1328_v38 = vadd.f32 1.0, %v2631_v58 }
 0x4e9   :  { %v2635_v15 = vpop.eup %2634  ;;  %v1329_v10 = vmul.f32 0.5, %v1327_v0  ;;  %v1335_v33 = vadd.f32 1.0, %v2633_v16 }
 0x4ea   :  { %v2637_v51 = vpop.eup %2636  ;;  %v1330_v2 = vmul.f32 0.5, %v1328_v38  ;;  %v1336_v8 = vadd.f32 1.0, %v2635_v15 }
 0x4eb   :  { %v2639_v4 = vpop.eup %2638  ;;  %v1337_v62 = vmul.f32 0.5, %v1335_v33  ;;  %v1357_v37 = vmul.f32 %v2637_v51, %v1329_v10 }
 0x4ec   :  { %v1338_v54 = vmul.f32 0.5, %v1336_v8  ;;  %v1358_v50 = vmul.f32 %v2639_v4, %v1330_v2  ;;  %v2641_v16 = vpop.eup %2640 }
 0x4ed   :  { %v1355_v32 = vmul.f32 %v1351_v39, %v1337_v62  ;;  %v2643_v38 = vpop.eup %2642  ;;  %v1345_v42 = vadd.f32 1.0, %v2641_v16 }
 0x4ee   :  { %v1356_v59 = vmul.f32 %v1352_v3, %v1338_v54  ;;  %v1346_v1 = vadd.f32 1.0, %v2643_v38 }
 0x4ef   :  { %v1359_v58 = vadd.f32 %v1357_v37, %v1355_v32 }
 0x4f0   :  { %v1360_v27 = vadd.f32 %v1358_v50, %v1356_v59  ;;  %v1348_v10 = vmul.f32 0.5, %v1346_v1 }
 0x4f1   :  { %2644 = vtanh.f32 %v1359_v58  ;;  %v1367_v0 = vrot.slane %v1359_v58, 4 }
 0x4f2   :  { %2646 = vtanh.f32 %v1360_v27  ;;  %v1368_v17 = vrot.slane %v1360_v27, 3  ;;  %v1347_v27 = vmul.f32 0.5, %v1345_v42 }
 0x4f4   :  { %v1369_v63 = vsel %vm501_vm2, %v1368_v17, %v1367_v0 }
 0x4f5   :  { %1436 = vmatmul.mubr.f32.vlgmr.msra.gmra.mrb[14].mxu0 %v1369_v63  ;;  %1507 = vmatmul.mubr.f32.vlgmr.msra.gmra.mrb[14].mxu1 %v1369_v63 }
 0x4f6   :  { %2416 = vmatpush1.bf16.msra.mxu0 %v2807_v14  ;;  %2448 = vmatpush1.bf16.msra.mxu1 %v2811_v18 }
 0x4f7   :  { %2418 = vmatprep.subr.bf16.mxu0 %v2815_v22  ;;  %2450 = vmatprep.subr.bf16.mxu1 %v2817_v23 }
 0x4f8   :  { %1653 = vmatprep.mubr.f32.mxu0 %v3298_v7  ;;  %1724 = vmatprep.mubr.f32.mxu1 %v3298_v7 }
 0x4fa   :  { %2420 = vmatpush1.bf16.msra.mxu0 %v2823_v30  ;;  %2452 = vmatpush1.bf16.msra.mxu1 %v2825_v31 }
 0x4fb   :  { %v2645_v15 = vpop.eup %2644  ;;  %2422 = vmatprep.subr.bf16.mxu0 %v2829_v35  ;;  %2454 = vmatprep.subr.bf16.mxu1 %v2831_v36 }
 0x4fc   :  { %v2647_v33 = vpop.eup %2646  ;;  %v3184_v51 = vmul.f32 %v2645_v15, %v1347_v27 }
 0x4fd   :  { %v3186_v2 = vmul.f32 %v2647_v33, %v1348_v10  ;;  %v3301_v33 = vld [vmem:[#allocation8_spill] sm:$0xff] }
 0x4fe   :  { %2424 = vmatpush1.bf16.msra.mxu0 %v2837_v44  ;;  %2456 = vmatpush1.bf16.msra.mxu1 %v2839_v45 }
 0x4ff   :  { %2426 = vmatprep.subr.bf16.mxu0 %v2843_v48  ;;  %2458 = vmatprep.subr.bf16.mxu1 %v2845_v49 }
 0x502   :  { %2428 = vmatpush1.bf16.msra.mxu0 %v2849_v56  ;;  %2460 = vmatpush1.bf16.msra.mxu1 %v2851_v57 }
 0x503   :  { %2430 = vmatprep.subr.bf16.mxu0 %v2855_v60  ;;  %2462 = vmatprep.subr.bf16.mxu1 %v2857_v61 }
 0x506   :  { %2432 = vmatpush1.bf16.msra.mxu0 %v2861_v5  ;;  %2464 = vmatpush1.bf16.msra.mxu1 %v2863_v6 }
 0x507   :  { %2434 = vmatprep.subr.bf16.mxu0 %v2870_v11  ;;  %2466 = vmatprep.subr.bf16.mxu1 %v2872_v12 }
 0x50a   :  { %2436 = vmatpush1.bf16.msra.mxu0 %v2880_v24  ;;  %2468 = vmatpush1.bf16.msra.mxu1 %v2882_v25 }
 0x50b   :  { %2438 = vmatprep.subr.bf16.mxu0 %v2886_v28  ;;  %2470 = vmatprep.subr.bf16.mxu1 %v2888_v29 }
 0x50e   :  { %2440 = vmatpush1.bf16.msra.mxu0 %v2892_v40  ;;  %2472 = vmatpush1.bf16.msra.mxu1 %v2894_v41 }
 0x50f   :  { %2442 = vmatprep.subr.bf16.mxu0 %v2898_v43  ;;  %2474 = vmatprep.subr.bf16.mxu1 %v2900_v46 }
 0x512   :  { %2444 = vmatpush1.bf16.msra.mxu0 %v2904_v52  ;;  %2476 = vmatpush1.bf16.msra.mxu1 %v2906_v53 }
 0x513   :  { %2478 = vmatprep.subr.bf16.mxu0 %v2801_v9  ;;  %2510 = vmatprep.subr.bf16.mxu1 %v2805_v13 }
 0x5c8   :  { %v1437_v8 = vpop.f32.mrb[14].mxu0  ;;  %v1508_v4 = vpop.f32.mrb[14].mxu1 }
 0x5c9   :  { %v1517_v39 = vrot.slane %v1437_v8, 3  ;;  %v1521_v62 = vrot.slane %v1437_v8, 4  ;;  %v1439_v37 = vpop.f32.mrb[15].mxu0  ;;  %v1510_v3 = vpop.f32.mrb[15].mxu1  ;;  %v1519_v58 = vrot.slane %v1508_v4, 3  ;;  %v1523_v0 = vrot.slane %v1508_v4, 4 }
 0x5ca   :  { %v1518_v54 = vrot.slane %v1439_v37, 3  ;;  %v1522_v50 = vrot.slane %v1439_v37, 4  ;;  %v1520_v27 = vrot.slane %v1510_v3, 3  ;;  %v1524_v15 = vrot.slane %v1510_v3, 4 }
 0x5cb   :  { %v1533_v32 = vadd.f32 %v1517_v39, %v2953_v20  ;;  %v1537_v59 = vadd.f32 %v1521_v62, %v2959_v34  ;;  %v1535_v42 = vadd.f32 %v1519_v58, %v2957_v26  ;;  %v1539_v1 = vadd.f32 %v1523_v0, %v2966_v55 }
 0x5cc   :  { %v1534_v17 = vadd.f32 %v1518_v54, %v2955_v21  ;;  %v1538_v9 = vadd.f32 %v1522_v50, %v2962_v47  ;;  %v1536_v10 = vadd.f32 %v1520_v27, %v2973_v19  ;;  %v1540_v8 = vadd.f32 %v1524_v15, %v3301_v33 }
 0x5cd   :  { %v1541_v16 = vmul.f32 0.5, %v1533_v32  ;;  %v1542_v13 = vmul.f32 0.5, %v1537_v59 }
 0x5ce   :  { %v1549_v38 = vmul.f32 0.5, %v1534_v17  ;;  %v1550_v63 = vmul.f32 0.5, %v1538_v9  ;;  %v1559_v4 = vmul.f32 0.5, %v1536_v10  ;;  %v1560_v62 = vmul.f32 0.5, %v1540_v8 }
 0x5cf   :  { %2648 = vtanh.f32 %v1541_v16 }
 0x5d0   :  { %2650 = vtanh.f32 %v1542_v13  ;;  %v1569_v13 = vrot.slane %v3184_v51, 7 }
 0x5d1   :  { %2652 = vtanh.f32 %v1549_v38 }
 0x5d2   :  { %2654 = vtanh.f32 %v1550_v63 }
 0x5d3   :  { %2656 = vtanh.f32 %v1535_v42  ;;  %v1570_v42 = vrot.slane %v3186_v2, 7 }
 0x5d4   :  { %2658 = vtanh.f32 %v1539_v1 }
 0x5d5   :  { %2660 = vtanh.f32 %v1559_v4 }
 0x5d6   :  { %2662 = vtanh.f32 %v1560_v62 }
 0x5d9   :  { %v2649_v39 = vpop.eup %2648 }
 0x5da   :  { %v2651_v37 = vpop.eup %2650  ;;  %v1545_v54 = vadd.f32 1.0, %v2649_v39 }
 0x5db   :  { %v2653_v50 = vpop.eup %2652  ;;  %v1546_v32 = vadd.f32 1.0, %v2651_v37 }
 0x5dc   :  { %v2655_v59 = vpop.eup %2654  ;;  %v1547_v58 = vmul.f32 0.5, %v1545_v54  ;;  %v1553_v0 = vadd.f32 1.0, %v2653_v50 }
 0x5dd   :  { %v2657_v17 = vpop.eup %2656  ;;  %v1548_v3 = vmul.f32 0.5, %v1546_v32  ;;  %v1554_v9 = vadd.f32 1.0, %v2655_v59 }
 0x5de   :  { %v2659_v16 = vpop.eup %2658  ;;  %v1555_v38 = vmul.f32 0.5, %v1553_v0  ;;  %v1575_v63 = vmul.f32 %v2657_v17, %v1547_v58 }
 0x5df   :  { %v1556_v1 = vmul.f32 0.5, %v1554_v9  ;;  %v1576_v27 = vmul.f32 %v2659_v16, %v1548_v3  ;;  %v2661_v54 = vpop.eup %2660 }
 0x5e0   :  { %v1573_v15 = vmul.f32 %v1569_v13, %v1555_v38  ;;  %v2663_v50 = vpop.eup %2662  ;;  %v1563_v51 = vadd.f32 1.0, %v2661_v54 }
 0x5e1   :  { %v1574_v10 = vmul.f32 %v1570_v42, %v1556_v1  ;;  %v1564_v2 = vadd.f32 1.0, %v2663_v50 }
 0x5e2   :  { %v1577_v8 = vadd.f32 %v1575_v63, %v1573_v15  ;;  %v1565_v32 = vmul.f32 0.5, %v1563_v51 }
 0x5e3   :  { %v1578_v39 = vadd.f32 %v1576_v27, %v1574_v10  ;;  %v1566_v58 = vmul.f32 0.5, %v1564_v2 }
 0x5e4   :  { %2664 = vtanh.f32 %v1577_v8  ;;  %v1585_v37 = vrot.slane %v1577_v8, 5 }
 0x5e5   :  { %2666 = vtanh.f32 %v1578_v39  ;;  %v1586_v4 = vrot.slane %v1578_v39, 4 }
 0x5e7   :  { %v1587_v62 = vsel %vm501_vm2, %v1586_v4, %v1585_v37 }
 0x5e8   :  { %1654 = vmatmul.mubr.f32.vlgmr.msra.gmra.mrb[16].mxu0 %v1587_v62  ;;  %1725 = vmatmul.mubr.f32.vlgmr.msra.gmra.mrb[16].mxu1 %v1587_v62 }
 0x5e9   :  { %2480 = vmatpush1.bf16.msra.mxu0 %v2807_v14  ;;  %2512 = vmatpush1.bf16.msra.mxu1 %v2811_v18 }
 0x5ea   :  { %2482 = vmatprep.subr.bf16.mxu0 %v2815_v22  ;;  %2514 = vmatprep.subr.bf16.mxu1 %v2817_v23 }
 0x5eb   :  { %1871 = vmatprep.mubr.f32.mxu0 %v3298_v7  ;;  %1942 = vmatprep.mubr.f32.mxu1 %v3298_v7 }
 0x5ed   :  { %2484 = vmatpush1.bf16.msra.mxu0 %v2823_v30  ;;  %2516 = vmatpush1.bf16.msra.mxu1 %v2825_v31 }
 0x5ee   :  { %v2665_v59 = vpop.eup %2664  ;;  %2486 = vmatprep.subr.bf16.mxu0 %v2829_v35  ;;  %2518 = vmatprep.subr.bf16.mxu1 %v2831_v36 }
 0x5ef   :  { %v2667_v14 = vpop.eup %2666  ;;  %v3233_v18 = vmul.f32 %v2665_v59, %v1565_v32 }
 0x5f0   :  { %v3235_v22 = vmul.f32 %v2667_v14, %v1566_v58 }
 0x5f1   :  { %2488 = vmatpush1.bf16.msra.mxu0 %v2837_v44  ;;  %2520 = vmatpush1.bf16.msra.mxu1 %v2839_v45 }
 0x5f2   :  { %2490 = vmatprep.subr.bf16.mxu0 %v2843_v48  ;;  %2522 = vmatprep.subr.bf16.mxu1 %v2845_v49  ;;  %v1788_v15 = vrot.slane %v3235_v22, 7 }
 0x5f5   :  { %2492 = vmatpush1.bf16.msra.mxu0 %v2849_v56  ;;  %2524 = vmatpush1.bf16.msra.mxu1 %v2851_v57 }
 0x5f6   :  { %2494 = vmatprep.subr.bf16.mxu0 %v2855_v60  ;;  %2526 = vmatprep.subr.bf16.mxu1 %v2857_v61 }
 0x5f9   :  { %2496 = vmatpush1.bf16.msra.mxu0 %v2861_v5  ;;  %2528 = vmatpush1.bf16.msra.mxu1 %v2863_v6 }
 0x5fa   :  { %2498 = vmatprep.subr.bf16.mxu0 %v2870_v11  ;;  %2530 = vmatprep.subr.bf16.mxu1 %v2872_v12 }
 0x5fd   :  { %2500 = vmatpush1.bf16.msra.mxu0 %v2880_v24  ;;  %2532 = vmatpush1.bf16.msra.mxu1 %v2882_v25 }
 0x5fe   :  { %2502 = vmatprep.subr.bf16.mxu0 %v2886_v28  ;;  %2534 = vmatprep.subr.bf16.mxu1 %v2888_v29 }
 0x601   :  { %2504 = vmatpush1.bf16.msra.mxu0 %v2892_v40  ;;  %2536 = vmatpush1.bf16.msra.mxu1 %v2894_v41 }
 0x602   :  { %2506 = vmatprep.subr.bf16.mxu0 %v2898_v43  ;;  %2538 = vmatprep.subr.bf16.mxu1 %v2900_v46 }
 0x605   :  { %2508 = vmatpush1.bf16.msra.mxu0 %v2904_v52  ;;  %2540 = vmatpush1.bf16.msra.mxu1 %v2906_v53 }
 0x6bb   :  { %v1655_v23 = vpop.f32.mrb[16].mxu0  ;;  %v1726_v30 = vpop.f32.mrb[16].mxu1 }
 0x6bc   :  { %v1735_v31 = vrot.slane %v1655_v23, 2  ;;  %v1739_v35 = vrot.slane %v1655_v23, 3  ;;  %v1657_v36 = vpop.f32.mrb[17].mxu0  ;;  %v1728_v44 = vpop.f32.mrb[17].mxu1  ;;  %v1737_v57 = vrot.slane %v1726_v30, 2  ;;  %v1741_v60 = vrot.slane %v1726_v30, 3 }
 0x6bd   :  { %v1736_v45 = vrot.slane %v1657_v36, 2  ;;  %v1740_v48 = vrot.slane %v1657_v36, 3  ;;  %v1738_v29 = vrot.slane %v1728_v44, 2  ;;  %v1742_v40 = vrot.slane %v1728_v44, 3 }
 0x6be   :  { %v1751_v49 = vadd.f32 %v1735_v31, %v2953_v20  ;;  %v1755_v56 = vadd.f32 %v1739_v35, %v2959_v34  ;;  %v1753_v25 = vadd.f32 %v1737_v57, %v2957_v26  ;;  %v1757_v28 = vadd.f32 %v1741_v60, %v2966_v55 }
 0x6bf   :  { %v1752_v61 = vadd.f32 %v1736_v45, %v2955_v21  ;;  %v1756_v5 = vadd.f32 %v1740_v48, %v2962_v47  ;;  %v1754_v41 = vadd.f32 %v1738_v29, %v2973_v19  ;;  %v1758_v43 = vadd.f32 %v1742_v40, %v3301_v33 }
 0x6c0   :  { %v1759_v6 = vmul.f32 0.5, %v1751_v49  ;;  %v1760_v11 = vmul.f32 0.5, %v1755_v56  ;;  %v1787_v19 = vrot.slane %v3233_v18, 7 }
 0x6c1   :  { %v1767_v12 = vmul.f32 0.5, %v1752_v61  ;;  %v1768_v24 = vmul.f32 0.5, %v1756_v5  ;;  %v1777_v46 = vmul.f32 0.5, %v1754_v41  ;;  %v1778_v53 = vmul.f32 0.5, %v1758_v43 }
 0x6c2   :  { %2668 = vtanh.f32 %v1759_v6 }
 0x6c3   :  { %2670 = vtanh.f32 %v1760_v11 }
 0x6c4   :  { %2672 = vtanh.f32 %v1767_v12 }
 0x6c5   :  { %2674 = vtanh.f32 %v1768_v24 }
 0x6c6   :  { %2676 = vtanh.f32 %v1753_v25 }
 0x6c7   :  { %2678 = vtanh.f32 %v1757_v28 }
 0x6c8   :  { %2680 = vtanh.f32 %v1777_v46 }
 0x6c9   :  { %2682 = vtanh.f32 %v1778_v53 }
 0x6cc   :  { %v2669_v52 = vpop.eup %2668 }
 0x6cd   :  { %v2671_v7 = vpop.eup %2670  ;;  %v1763_v0 = vadd.f32 1.0, %v2669_v52 }
 0x6ce   :  { %v2673_v17 = vpop.eup %2672  ;;  %v1764_v3 = vadd.f32 1.0, %v2671_v7 }
 0x6cf   :  { %v2675_v9 = vpop.eup %2674  ;;  %v1765_v16 = vmul.f32 0.5, %v1763_v0  ;;  %v1771_v13 = vadd.f32 1.0, %v2673_v17 }
 0x6d0   :  { %v2677_v38 = vpop.eup %2676  ;;  %v1766_v63 = vmul.f32 0.5, %v1764_v3  ;;  %v1772_v42 = vadd.f32 1.0, %v2675_v9 }
 0x6d1   :  { %v2679_v1 = vpop.eup %2678  ;;  %v1773_v27 = vmul.f32 0.5, %v1771_v13  ;;  %v1793_v33 = vmul.f32 %v2677_v38, %v1765_v16 }
 0x6d2   :  { %v1774_v10 = vmul.f32 0.5, %v1772_v42  ;;  %v1794_v8 = vmul.f32 %v2679_v1, %v1766_v63  ;;  %v2681_v51 = vpop.eup %2680 }
 0x6d3   :  { %v1791_v39 = vmul.f32 %v1787_v19, %v1773_v27  ;;  %v2683_v2 = vpop.eup %2682  ;;  %v1781_v59 = vadd.f32 1.0, %v2681_v51 }
 0x6d4   :  { %v1792_v37 = vmul.f32 %v1788_v15, %v1774_v10  ;;  %v1782_v58 = vadd.f32 1.0, %v2683_v2 }
 0x6d5   :  { %v1795_v4 = vadd.f32 %v1793_v33, %v1791_v39  ;;  %v1783_v14 = vmul.f32 0.5, %v1781_v59 }
 0x6d6   :  { %v1796_v54 = vadd.f32 %v1794_v8, %v1792_v37  ;;  %v1784_v22 = vmul.f32 0.5, %v1782_v58 }
 0x6d7   :  { %2684 = vtanh.f32 %v1795_v4  ;;  %v1803_v50 = vrot.slane %v1795_v4, 6 }
 0x6d8   :  { %2686 = vtanh.f32 %v1796_v54  ;;  %v1804_v62 = vrot.slane %v1796_v54, 5 }
 0x6da   :  { %v1805_v32 = vsel %vm501_vm2, %v1804_v62, %v1803_v50 }
 0x6db   :  { %1872 = vmatmul.mubr.f32.vlgmr.msra.gmra.mrb[18].mxu0 %v1805_v32  ;;  %1943 = vmatmul.mubr.f32.vlgmr.msra.gmra.mrb[18].mxu1 %v1805_v32 }
 0x6e1   :  { %v2685_v18 = vpop.eup %2684 }
 0x6e2   :  { %v2687_v23 = vpop.eup %2686  ;;  %v1799_v30 = vmul.f32 %v2685_v18, %v1783_v14 }
 0x6e3   :  { %v1800_v31 = vmul.f32 %v2687_v23, %v1784_v22 }
 0x6e4   :  { %v1989_v9 = vrot.slane %v1799_v30, 7 }
 0x6e5   :  { %v1990_v13 = vrot.slane %v1800_v31, 7 }
 0x7ae   :  { %v1873_v35 = vpop.f32.mrb[18].mxu0  ;;  %v1944_v36 = vpop.f32.mrb[18].mxu1 }
 0x7af   :  { %v1951_v44 = vrot.slane %v1873_v35, 1  ;;  %v1954_v45 = vrot.slane %v1873_v35, 2  ;;  %v1875_v48 = vpop.f32.mrb[19].mxu0  ;;  %v1946_v49 = vpop.f32.mrb[19].mxu1  ;;  %v1953_v5 = vrot.slane %v1944_v36, 1  ;;  %v1956_v6 = vrot.slane %v1944_v36, 2 }
 0x7b0   :  { %v1952_v56 = vrot.slane %v1875_v48, 1  ;;  %v1955_v57 = vrot.slane %v1875_v48, 2 }
 0x7b1   :  { %v1963_v60 = vadd.f32 %v1951_v44, %v2953_v20  ;;  %v1966_v61 = vadd.f32 %v1954_v45, %v2959_v34  ;;  %v1965_v40 = vadd.f32 %v1953_v5, %v2957_v26  ;;  %v1968_v41 = vadd.f32 %v1956_v6, %v2966_v55 }
 0x7b2   :  { %v1964_v11 = vadd.f32 %v1952_v56, %v2955_v21  ;;  %v1967_v12 = vadd.f32 %v1955_v57, %v2962_v47 }
 0x7b3   :  { %v1969_v24 = vmul.f32 0.5, %v1963_v60  ;;  %v1970_v25 = vmul.f32 0.5, %v1966_v61 }
 0x7b4   :  { %v1977_v28 = vmul.f32 0.5, %v1964_v11  ;;  %v1978_v29 = vmul.f32 0.5, %v1967_v12 }
 0x7b5   :  { %2688 = vtanh.f32 %v1969_v24 }
 0x7b6   :  { %2690 = vtanh.f32 %v1970_v25 }
 0x7b7   :  { %2692 = vtanh.f32 %v1977_v28 }
 0x7b8   :  { %2694 = vtanh.f32 %v1978_v29 }
 0x7b9   :  { %2696 = vtanh.f32 %v1965_v40 }
 0x7ba   :  { %2698 = vtanh.f32 %v1968_v41 }
 0x7bf   :  { %v2689_v20 = vpop.eup %2688 }
 0x7c0   :  { %v2691_v34 = vpop.eup %2690  ;;  %v1973_v43 = vadd.f32 1.0, %v2689_v20 }
 0x7c1   :  { %v2693_v21 = vpop.eup %2692  ;;  %v1974_v46 = vadd.f32 1.0, %v2691_v34 }
 0x7c2   :  { %v2695_v47 = vpop.eup %2694  ;;  %v1975_v52 = vmul.f32 0.5, %v1973_v43  ;;  %v1981_v53 = vadd.f32 1.0, %v2693_v21 }
 0x7c3   :  { %v2697_v7 = vpop.eup %2696  ;;  %v1976_v0 = vmul.f32 0.5, %v1974_v46  ;;  %v1982_v17 = vadd.f32 1.0, %v2695_v47 }
 0x7c4   :  { %v2699_v3 = vpop.eup %2698  ;;  %v1983_v26 = vmul.f32 0.5, %v1981_v53  ;;  %v1995_v16 = vmul.f32 %v2697_v7, %v1975_v52 }
 0x7c5   :  { %v1984_v55 = vmul.f32 0.5, %v1982_v17  ;;  %v1996_v38 = vmul.f32 %v2699_v3, %v1976_v0 }
 0x7c6   :  { %v1993_v63 = vmul.f32 %v1989_v9, %v1983_v26 }
 0x7c7   :  { %v1994_v42 = vmul.f32 %v1990_v13, %v1984_v55 }
 0x7c8   :  { %v1997_v1 = vadd.f32 %v1995_v16, %v1993_v63 }
 0x7c9   :  { %v1998_v19 = vadd.f32 %v1996_v38, %v1994_v42 }
 0x7ca   :  { %2004 = vst [vmem:[#allocation5 - $0x7] sm:$0x80] %v1997_v1 }
 0x7cb   :  { %v2001_v27 = vrot.slane %v1998_v19, 7 }
 0x7cd   :  { %2005 = vst [vmem:[#allocation5 + $0x1] sm:$0x1] %v2001_v27 }
 0x7ce   :  { %2733 = shalt.err (!%p2730_p12)
}
 0x7cf   :  { %s2734_s14 = scalar_lea.hbm %s3292_s4, 32 }
 0x7d0   :  { %p2735_p13 = scmp.ne.s32.totalorder %s3292_s4, %s2734_s14  ;;  %p2738_p0 = scmp.lt.u32.totalorder %s2734_s14, %s3292_s4 }
 0x7d2   :  { %p2740_p1 = pnand %p2738_p0, %p2735_p13 }
 0x7d4   :  { %2743 = shalt.err (!%p2740_p1)
}
 0x7d5   :  { %2015 = dma.vmem_to_hbm [thread:$0]  %s2013_s10, 32, %s3292_s4, [#allocation4]  }
 0x7d6   :  { %2746 = dma.done.wait [#allocation4], 32  }
 0x7d7   :  { %2747 = vsyncadd [#allocation4], 4294967264 }
 0x7d8   :  { %2019 = vsyncpa [#allocation3], 1 }
 0x7d9   :  { %2020 = vsyncpa [#allocation4], 1 }

</bundles_post_ra>
